<compile_context>
chip_gen: v7x
topology: tpu7x:2x2x1
jax: 0.10.0
libtpu: 0.0.40
codegen_flags: <defaults>
</compile_context>

<pallas_src>
import functools

import jax
import jax.numpy as jnp
from jax.experimental import pallas as pl
from jax.experimental.pallas import tpu as pltpu

_SUBLANE = {2: 16, 4: 8}  # rows per packed sublane group, by operand itemsize


def _round_up(n, m):
    return ((n + m - 1) // m) * m


def _mlp_kernel(num_layers, bf16_epilogue, x_ref, *refs):
    """Fused MLP over one batch tile.

    refs = (w0, b0, w1, b1, ..., w{L-1}, b{L-1}, out_ref).
    Weights are (in_i, out_i), biases (1, out_i), at their TRUE (unpadded)
    sizes; Mosaic handles the internal lane layout.
    """
    out_ref = refs[-1]
    params = refs[:-1]
    h = x_ref[...]
    for i in range(num_layers):
        w_ref = params[2 * i]
        b_ref = params[2 * i + 1]
        last = i == num_layers - 1
        if h.dtype != w_ref.dtype:
            # Reduced-precision operand path with f32 epilogue: cast back to
            # the MXU operand dtype right before the matmul.
            h = h.astype(w_ref.dtype)
        acc_dtype = jnp.float32
        if bf16_epilogue and not last and w_ref.dtype == jnp.bfloat16:
            # v6e/v7x have native bf16 VALUs: keep the hidden-layer epilogue in
            # bf16 and skip the per-layer f32<->bf16 round trips.  (Keep the
            # default f32 epilogue on v5e.)
            acc_dtype = jnp.bfloat16
        acc = jnp.dot(h, w_ref[...], preferred_element_type=acc_dtype)   # MXU
        acc = acc + b_ref[...].astype(acc_dtype)                         # VPU bias add
        if not last:
            acc = jnp.maximum(acc, 0.0)                                  # ReLU
        h = acc
    out_ref[...] = h.astype(out_ref.dtype)


def cluster_map_forward(x, weights_t, biases, *, batch_tile=None,
                        param_dtype=None, out_dtype=None,
                        bf16_epilogue=False, single_buffer_params=False):
    """ClusterMap forward: Linear -> ReLU -> ... -> Linear, fused in one kernel.

    x:          (B, input_size)
    weights_t:  list of (in_i, out_i) arrays (pre-transposed: h = h @ W + b)
    biases:     list of (1, out_i) arrays (kept f32 even on the bf16 path)
    param_dtype: optional reduced precision (e.g. jnp.bfloat16) for x / W.
    out_dtype:   output dtype (defaults to x's original dtype).
    bf16_epilogue: keep hidden-layer bias/ReLU in bf16 (v6e/v7x only).
    single_buffer_params: single-buffer the grid-invariant weights/biases
                          (useful for large ClusterMaps on v7x's 64 MiB VMEM).
    """
    num_layers = len(weights_t)
    B, in_size = x.shape
    out_size = int(weights_t[-1].shape[1])
    if out_dtype is None:
        out_dtype = x.dtype

    if param_dtype is not None:
        # Cast only the MXU operands; biases stay f32 (VPU-only use).
        x = x.astype(param_dtype)
        weights_t = [w.astype(param_dtype) for w in weights_t]

    in_itemsize = jnp.dtype(x.dtype).itemsize
    out_itemsize = jnp.dtype(out_dtype).itemsize
    sub = _SUBLANE.get(in_itemsize, 8)

    param_bytes = 0
    for w, b in zip(weights_t, biases):
        param_bytes += int(w.size) * jnp.dtype(w.dtype).itemsize
        param_bytes += int(b.size) * jnp.dtype(b.dtype).itemsize
    param_bufs = 1 if single_buffer_params else 2

    widest = max([in_size, out_size] + [int(w.shape[1]) for w in weights_t])

    # ---- batch tile: as large as the VMEM budget allows (fewer grid steps) ----
    if batch_tile is None:
        per_row = 2 * (in_size * in_itemsize + out_size * out_itemsize)  # dbl-buffered I/O
        per_row += 3 * widest * 4                                        # live f32 activations
        budget = (32 << 20) - param_bufs * param_bytes
        cap_rows = max(sub, (budget // per_row) // sub * sub)
        batch_tile = int(min(_round_up(B, sub), 1024, cap_rows))
    batch_tile = max(sub, _round_up(int(batch_tile), sub))

    grid_len = pl.cdiv(B, batch_tile)
    # v7x megacore: when the batch is split, prefer an even number of tiles so
    # both TensorCores get equal shares of the "parallel" axis.
    if grid_len > 1 and grid_len % 2 == 1:
        alt = _round_up(pl.cdiv(B, grid_len + 1), sub)
        if 0 < alt <= batch_tile:
            batch_tile = alt
            grid_len = pl.cdiv(B, batch_tile)

    # ---- BlockSpecs: feature dims are the TRUE array dims (no padding) -------
    if single_buffer_params:
        def param_spec(shape):
            return pl.BlockSpec(shape, lambda i: (0, 0),
                                pipeline_mode=pl.Buffered(1))
    else:
        def param_spec(shape):
            return pl.BlockSpec(shape, lambda i: (0, 0))

    in_specs = [pl.BlockSpec((batch_tile, in_size), lambda i: (i, 0))]
    args = [x]
    for w, b in zip(weights_t, biases):
        in_specs.append(param_spec(tuple(w.shape)))
        in_specs.append(param_spec(tuple(b.shape)))
        args.append(w)
        args.append(b)
    out_spec = pl.BlockSpec((batch_tile, out_size), lambda i: (i, 0))

    # ---- explicit VMEM budget: v5e's default scoped VMEM is only 16 MiB;
    #      stay comfortably below v7x's 64 MiB physical VMEM. -------------------
    io_bytes = batch_tile * (in_size * in_itemsize + out_size * out_itemsize)
    act_bytes = batch_tile * widest * 4
    est = 2 * io_bytes + param_bufs * param_bytes + 4 * act_bytes
    vmem_limit = int(min(48 << 20, max(32 << 20, est + (8 << 20))))

    flops = 2 * B * sum(int(w.shape[0]) * int(w.shape[1]) for w in weights_t)
    bytes_accessed = (int(x.size) * in_itemsize
                      + B * out_size * out_itemsize + param_bytes)
    cost = pl.CostEstimate(flops=int(flops), transcendentals=0,
                           bytes_accessed=int(bytes_accessed))

    return pl.pallas_call(
        functools.partial(_mlp_kernel, num_layers, bf16_epilogue),
        out_shape=jax.ShapeDtypeStruct((B, out_size), out_dtype),
        grid=(grid_len,),
        in_specs=in_specs,
        out_specs=out_spec,
        compiler_params=pltpu.CompilerParams(
            dimension_semantics=("parallel",),
            vmem_limit_bytes=vmem_limit,
        ),
        cost_estimate=cost,
    )(*args)


def init_cluster_map_params(key, input_size, layer_sizes):
    """Deterministic PyTorch-style nn.Linear init: U(-1/sqrt(fan_in), 1/sqrt(fan_in))."""
    weights_t, biases = [], []
    prev = input_size
    keys = jax.random.split(key, 2 * len(layer_sizes))
    for i, size in enumerate(layer_sizes):
        bound = 1.0 / (prev ** 0.5)
        W = jax.random.uniform(keys[2 * i], (size, prev), jnp.float32, -bound, bound)
        b = jax.random.uniform(keys[2 * i + 1], (size,), jnp.float32, -bound, bound)
        weights_t.append(W.T)                 # (in, out) so layers compute h @ W
        biases.append(b.reshape(1, size))     # (1, out) for broadcast add
        prev = size
    return weights_t, biases


if __name__ == "__main__":
    key = jax.random.PRNGKey(0)
    k_x, k_p = jax.random.split(key)

    input_size = 32
    layer_sizes = [64, 48, 16]
    batch = 512

    x = jax.random.normal(k_x, (batch, input_size), dtype=jnp.float32)
    weights_t, biases = init_cluster_map_params(k_p, input_size, layer_sizes)

    def ref_forward(xx):
        h = xx
        for i, (W, b) in enumerate(zip(weights_t, biases)):
            h = h @ W + b
            if i != len(weights_t) - 1:
                h = jnp.maximum(h, 0.0)
        return h

    ref = ref_forward(x)

    # f32 path (exact nn.Linear semantics).
    out = jax.block_until_ready(cluster_map_forward(x, weights_t, biases))
    assert out.shape == (batch, layer_sizes[-1])
    assert jnp.allclose(out, ref, atol=1e-4, rtol=1e-4), "mismatch vs f32 reference"

    # Partial last tile: B not a multiple of the batch tile; out-of-range rows
    # must not leak into valid output rows.
    x_odd = x[:500]
    out_odd = jax.block_until_ready(
        cluster_map_forward(x_odd, weights_t, biases, batch_tile=256))
    assert out_odd.shape == (500, layer_sizes[-1])
    assert jnp.allclose(out_odd, ref_forward(x_odd), atol=1e-4, rtol=1e-4), \
        "mismatch vs reference (partial tile)"

    # bf16-operand path (f32 accumulation / f32 biases): halves MXU-operand DMA.
    out_bf16 = jax.block_until_ready(
        cluster_map_forward(x, weights_t, biases, param_dtype=jnp.bfloat16))
    assert out_bf16.shape == (batch, layer_sizes[-1])
    assert jnp.allclose(out_bf16.astype(jnp.float32), ref, atol=0.1, rtol=0.1), \
        "mismatch vs reference (bf16 operand path)"

    # bf16 epilogue + bf16 output (v6e/v7x fast path; still numerically correct
    # anywhere, just slower on v5e).
    out_bf16e = jax.block_until_ready(
        cluster_map_forward(x, weights_t, biases, param_dtype=jnp.bfloat16,
                            bf16_epilogue=True, out_dtype=jnp.bfloat16))
    assert out_bf16e.shape == (batch, layer_sizes[-1])
    assert out_bf16e.dtype == jnp.bfloat16
    assert jnp.allclose(out_bf16e.astype(jnp.float32), ref, atol=0.25, rtol=0.25), \
        "mismatch vs reference (bf16 epilogue path)"

    print("KERNEL_OK")
</pallas_src>

<mosaic_0001>
module attributes {stable_mosaic.version = 11 : i64} {
  func.func @_mlp_kernel(%arg0: i32, %arg1: memref<512x32xf32, #tpu.memory_space<vmem>>, %arg2: memref<32x64xf32, #tpu.memory_space<vmem>>, %arg3: memref<1x64xf32, #tpu.memory_space<vmem>>, %arg4: memref<64x48xf32, #tpu.memory_space<vmem>>, %arg5: memref<1x48xf32, #tpu.memory_space<vmem>>, %arg6: memref<48x16xf32, #tpu.memory_space<vmem>>, %arg7: memref<1x16xf32, #tpu.memory_space<vmem>>, %arg8: memref<512x16xf32, #tpu.memory_space<vmem>>) attributes {dimension_semantics = [#tpu.dimension_semantics<parallel>], iteration_bounds = array<i64: 1>, scalar_prefetch = 0 : i64, scratch_operands = 0 : i64, tpu.core_type = #tpu.core_type<tc>, window_params = [{transform_indices = @transform_0, window_bounds = array<i64: 512, 32>}, {pipeline_mode = #tpu.pipeline_mode<synchronous>, transform_indices = @transform_1, window_bounds = array<i64: 32, 64>}, {pipeline_mode = #tpu.pipeline_mode<synchronous>, transform_indices = @transform_2, window_bounds = array<i64: 1, 64>}, {pipeline_mode = #tpu.pipeline_mode<synchronous>, transform_indices = @transform_3, window_bounds = array<i64: 64, 48>}, {pipeline_mode = #tpu.pipeline_mode<synchronous>, transform_indices = @transform_4, window_bounds = array<i64: 1, 48>}, {pipeline_mode = #tpu.pipeline_mode<synchronous>, transform_indices = @transform_5, window_bounds = array<i64: 48, 16>}, {pipeline_mode = #tpu.pipeline_mode<synchronous>, transform_indices = @transform_6, window_bounds = array<i64: 1, 16>}, {transform_indices = @transform_7, window_bounds = array<i64: 512, 16>}]} {
    %c0 = arith.constant 0 : index
    %c0_0 = arith.constant 0 : index
    %0 = vector.load %arg1[%c0, %c0_0] : memref<512x32xf32, #tpu.memory_space<vmem>>, vector<512x32xf32>
    %c0_1 = arith.constant 0 : index
    %c0_2 = arith.constant 0 : index
    %1 = vector.load %arg2[%c0_1, %c0_2] : memref<32x64xf32, #tpu.memory_space<vmem>>, vector<32x64xf32>
    %cst = arith.constant dense<0.000000e+00> : vector<512x64xf32>
    %2 = tpu.matmul %0, %1, %cst {dimension_numbers = #tpu.dot_dimension_numbers<[1], [0], [0], [1], [0, 0, 1, 1], [], []>} : vector<512x32xf32>, vector<32x64xf32>, vector<512x64xf32> -> vector<512x64xf32>
    %c0_3 = arith.constant 0 : index
    %c0_4 = arith.constant 0 : index
    %3 = vector.load %arg3[%c0_3, %c0_4] : memref<1x64xf32, #tpu.memory_space<vmem>>, vector<1x64xf32>
    %4 = vector.broadcast %3 : vector<1x64xf32> to vector<512x64xf32>
    %5 = arith.addf %2, %4 : vector<512x64xf32>
    %cst_5 = arith.constant 0.000000e+00 : f32
    %6 = vector.broadcast %cst_5 : f32 to vector<512x64xf32>
    %7 = arith.maximumf %5, %6 : vector<512x64xf32>
    %c0_6 = arith.constant 0 : index
    %c0_7 = arith.constant 0 : index
    %8 = vector.load %arg4[%c0_6, %c0_7] : memref<64x48xf32, #tpu.memory_space<vmem>>, vector<64x48xf32>
    %cst_8 = arith.constant dense<0.000000e+00> : vector<512x48xf32>
    %9 = tpu.matmul %7, %8, %cst_8 {dimension_numbers = #tpu.dot_dimension_numbers<[1], [0], [0], [1], [0, 0, 1, 1], [], []>} : vector<512x64xf32>, vector<64x48xf32>, vector<512x48xf32> -> vector<512x48xf32>
    %c0_9 = arith.constant 0 : index
    %c0_10 = arith.constant 0 : index
    %10 = vector.load %arg5[%c0_9, %c0_10] : memref<1x48xf32, #tpu.memory_space<vmem>>, vector<1x48xf32>
    %11 = vector.broadcast %10 : vector<1x48xf32> to vector<512x48xf32>
    %12 = arith.addf %9, %11 : vector<512x48xf32>
    %cst_11 = arith.constant 0.000000e+00 : f32
    %13 = vector.broadcast %cst_11 : f32 to vector<512x48xf32>
    %14 = arith.maximumf %12, %13 : vector<512x48xf32>
    %c0_12 = arith.constant 0 : index
    %c0_13 = arith.constant 0 : index
    %15 = vector.load %arg6[%c0_12, %c0_13] : memref<48x16xf32, #tpu.memory_space<vmem>>, vector<48x16xf32>
    %cst_14 = arith.constant dense<0.000000e+00> : vector<512x16xf32>
    %16 = tpu.matmul %14, %15, %cst_14 {dimension_numbers = #tpu.dot_dimension_numbers<[1], [0], [0], [1], [0, 0, 1, 1], [], []>} : vector<512x48xf32>, vector<48x16xf32>, vector<512x16xf32> -> vector<512x16xf32>
    %c0_15 = arith.constant 0 : index
    %c0_16 = arith.constant 0 : index
    %17 = vector.load %arg7[%c0_15, %c0_16] : memref<1x16xf32, #tpu.memory_space<vmem>>, vector<1x16xf32>
    %18 = vector.broadcast %17 : vector<1x16xf32> to vector<512x16xf32>
    %19 = arith.addf %16, %18 : vector<512x16xf32>
    %c0_17 = arith.constant 0 : index
    %c0_18 = arith.constant 0 : index
    %20 = vector.load %arg8[%c0_17, %c0_18] : memref<512x16xf32, #tpu.memory_space<vmem>>, vector<512x16xf32>
    tpu.vector_store %arg8[%c0_17, %c0_18], %19 {strides = array<i32>} : memref<512x16xf32, #tpu.memory_space<vmem>>, vector<512x16xf32>,
    return
  }
  func.func @transform_0(%arg0: i32) -> (i32, i32) {
    %c0_i32 = arith.constant 0 : i32
    %c0_i32_0 = arith.constant 0 : i32
    return %arg0, %c0_i32 : i32, i32
  }
  func.func @transform_1(%arg0: i32) -> (i32, i32) {
    %c0_i32 = arith.constant 0 : i32
    %c0_i32_0 = arith.constant 0 : i32
    %c0_i32_1 = arith.constant 0 : i32
    return %c0_i32, %c0_i32_0 : i32, i32
  }
  func.func @transform_2(%arg0: i32) -> (i32, i32) {
    %c0_i32 = arith.constant 0 : i32
    %c0_i32_0 = arith.constant 0 : i32
    %c0_i32_1 = arith.constant 0 : i32
    return %c0_i32, %c0_i32_0 : i32, i32
  }
  func.func @transform_3(%arg0: i32) -> (i32, i32) {
    %c0_i32 = arith.constant 0 : i32
    %c0_i32_0 = arith.constant 0 : i32
    %c0_i32_1 = arith.constant 0 : i32
    return %c0_i32, %c0_i32_0 : i32, i32
  }
  func.func @transform_4(%arg0: i32) -> (i32, i32) {
    %c0_i32 = arith.constant 0 : i32
    %c0_i32_0 = arith.constant 0 : i32
    %c0_i32_1 = arith.constant 0 : i32
    return %c0_i32, %c0_i32_0 : i32, i32
  }
  func.func @transform_5(%arg0: i32) -> (i32, i32) {
    %c0_i32 = arith.constant 0 : i32
    %c0_i32_0 = arith.constant 0 : i32
    %c0_i32_1 = arith.constant 0 : i32
    return %c0_i32, %c0_i32_0 : i32, i32
  }
  func.func @transform_6(%arg0: i32) -> (i32, i32) {
    %c0_i32 = arith.constant 0 : i32
    %c0_i32_0 = arith.constant 0 : i32
    %c0_i32_1 = arith.constant 0 : i32
    return %c0_i32, %c0_i32_0 : i32, i32
  }
  func.func @transform_7(%arg0: i32) -> (i32, i32) {
    %c0_i32 = arith.constant 0 : i32
    %c0_i32_0 = arith.constant 0 : i32
    return %arg0, %c0_i32 : i32, i32
  }
}

</mosaic_0001>

<bundles_post_ra>
// kernel: tpu_custom_call.1
= control target key start
LH: loop header
LB: loop body
LE: loop exit
PB: predicated region body
PF: predicated region fallthrough
CT: control target
= control target key end

     0   :  { %vm101_vm0 = vcmask 261120   ;;  %vm758_vm1 = vcmask 523264   ;;  %vm1413_vm2 = vcmask 392192   ;;  %vm1991_vm3 = vcmask 130048   ;;  %s3866_s1 = inlined_call_operand.vmem [shape: f32[32,64], index: 1, kind: input, shape index: {}]   ;;  %s3867_s0 = inlined_call_operand.vmem [shape: f32[512,32], index: 0, kind: input, shape index: {}]   ;;  %s3868_s3 = inlined_call_operand.vmem [shape: f32[64,48], index: 3, kind: input, shape index: {}]   ;;  %s3869_s2 = inlined_call_operand.vmem [shape: f32[1,64], index: 2, kind: input, shape index: {}]   ;;  %s3870_s5 = inlined_call_operand.vmem [shape: f32[48,16], index: 5, kind: input, shape index: {}]   ;;  %s3871_s4 = inlined_call_operand.vmem [shape: f32[1,48], index: 4, kind: input, shape index: {}]   ;;  %s3872_s6 = inlined_call_operand.vmem [shape: f32[1,16], index: 6, kind: input, shape index: {}]   ;;  %s3873_s7 = inlined_call_operand.vmem [shape: f32[512,16], index: 7, kind: output, shape index: {}]  }
   0x1   :  { %v90_v0 = vld [vmem:[%s3866_s1] sm:$0xff]  ;;  %v91_v1 = vld [vmem:[%s3866_s1 + $0x8] sm:$0xff]  ;;  %v92_v2 = vld [vmem:[%s3866_s1 + $0x10] sm:$0xff] }
   0x2   :  { %v2789_v3 = vpack.c.bf16 %v91_v1, %v90_v0  ;;  %v93_v4 = vld [vmem:[%s3866_s1 + $0x18] sm:$0xff]  ;;  %v26_v5 = vld [vmem:[%s3867_s0] sm:$0xff]  ;;  %v27_v7 = vld [vmem:[%s3867_s0 + $0x8] sm:$0xff] }
   0x3   :  { %v2793_v6 = vpack.c.bf16 %v93_v4, %v92_v2  ;;  %2473 = vmatprep.mubr.msk.f32.mxu0 %vm101_vm0, %v26_v5  ;;  %v28_v8 = vld [vmem:[%s3867_s0 + $0x10] sm:$0xff]  ;;  %v29_v9 = vld [vmem:[%s3867_s0 + $0x18] sm:$0xff]  ;;  %v58_v10 = vld [vmem:[%s3867_s0 + $0x100] sm:$0xff] }
   0x4   :  { %2790 = vmatprep.subr.bf16.mxu0 %v2789_v3  ;;  %2825 = vmatprep.subr.bf16.mxu1 %v2789_v3  ;;  %v59_v11 = vld [vmem:[%s3867_s0 + $0x108] sm:$0xff]  ;;  %v60_v12 = vld [vmem:[%s3867_s0 + $0x110] sm:$0xff]  ;;  %v30_v13 = vld [vmem:[%s3867_s0 + $0x20] sm:$0xff] }
   0x5   :  { %2792 = vmatpush3.bf16.msra.mxu0 %v2789_v3  ;;  %2827 = vmatpush3.bf16.msra.mxu1 %v2789_v3  ;;  %v61_v14 = vld [vmem:[%s3867_s0 + $0x118] sm:$0xff]  ;;  %v31_v15 = vld [vmem:[%s3867_s0 + $0x28] sm:$0xff]  ;;  %v62_v16 = vld [vmem:[%s3867_s0 + $0x120] sm:$0xff] }
   0x6   :  { %2794 = vmatprep.subr.bf16.mxu0 %v2793_v6  ;;  %2826 = vmatprep.subr.bf16.mxu1 %v2793_v6  ;;  %v32_v17 = vld [vmem:[%s3867_s0 + $0x30] sm:$0xff]  ;;  %v63_v18 = vld [vmem:[%s3867_s0 + $0x128] sm:$0xff]  ;;  %v33_v19 = vld [vmem:[%s3867_s0 + $0x38] sm:$0xff] }
   0x7   :  { %2521 = vmatprep.mubr.msk.f32.mxu1 %vm101_vm0, %v58_v10  ;;  %v64_v20 = vld [vmem:[%s3867_s0 + $0x130] sm:$0xff]  ;;  %v34_v21 = vld [vmem:[%s3867_s0 + $0x40] sm:$0xff]  ;;  %v65_v22 = vld [vmem:[%s3867_s0 + $0x138] sm:$0xff] }
   0x8   :  { %v743_v23 = vld [vmem:[%s3868_s3] sm:$0xff]  ;;  %v744_v24 = vld [vmem:[%s3868_s3 + $0x8] sm:$0xff]  ;;  %v745_v25 = vld [vmem:[%s3868_s3 + $0x10] sm:$0xff] }
   0x9   :  { %2796 = vmatpush3.bf16.msra.mxu0 %v2793_v6  ;;  %2828 = vmatpush3.bf16.msra.mxu1 %v2793_v6  ;;  %v746_v26 = vld [vmem:[%s3868_s3 + $0x18] sm:$0xff]  ;;  %v35_v27 = vld [vmem:[%s3867_s0 + $0x48] sm:$0xff]  ;;  %v66_v28 = vld [vmem:[%s3867_s0 + $0x140] sm:$0xff]  ;;  %v2797_v29 = vpack.c.bf16 %v744_v24, %v743_v23 }
   0xa   :  { %v36_v30 = vld [vmem:[%s3867_s0 + $0x50] sm:$0xff]  ;;  %v2801_v31 = vpack.c.bf16 %v746_v26, %v745_v25  ;;  %v747_v32 = vld [vmem:[%s3868_s3 + $0x20] sm:$0xff]  ;;  %v748_v33 = vld [vmem:[%s3868_s3 + $0x28] sm:$0xff] }
   0xb   :  { %2798 = vmatprep.subr.bf16.mxu1 %v2797_v29  ;;  %v67_v34 = vld [vmem:[%s3867_s0 + $0x148] sm:$0xff]  ;;  %v37_v35 = vld [vmem:[%s3867_s0 + $0x58] sm:$0xff]  ;;  %v68_v36 = vld [vmem:[%s3867_s0 + $0x150] sm:$0xff]  ;;  %v2805_v38 = vpack.c.bf16 %v748_v33, %v747_v32 }
   0xc   :  { %2474 = vmatmul.mubr.msk.f32.vlgmr.msra.gmra.mrb[0].mxu0 %vm101_vm0, %v27_v7  ;;  %2522 = vmatmul.mubr.msk.f32.vlgmr.msra.gmra.mrb[0].mxu1 %vm101_vm0, %v59_v11  ;;  %v38_v37 = vld [vmem:[%s3867_s0 + $0x60] sm:$0xff]  ;;  %v749_v39 = vld [vmem:[%s3868_s3 + $0x30] sm:$0xff]  ;;  %v750_v40 = vld [vmem:[%s3868_s3 + $0x38] sm:$0xff] }
   0xd   :  { %2476 = vmatprep.mubr.msk.f32.mxu0 %vm101_vm0, %v28_v8  ;;  %2524 = vmatprep.mubr.msk.f32.mxu1 %vm101_vm0, %v60_v12  ;;  %v69_v41 = vld [vmem:[%s3867_s0 + $0x158] sm:$0xff]  ;;  %v39_v42 = vld [vmem:[%s3867_s0 + $0x68] sm:$0xff]  ;;  %v70_v43 = vld [vmem:[%s3867_s0 + $0x160] sm:$0xff]  ;;  %v2809_v45 = vpack.c.bf16 %v750_v40, %v749_v39 }
   0xe   :  { %2800 = vmatpush3.bf16.msra.mxu1 %v2797_v29  ;;  %v40_v44 = vld [vmem:[%s3867_s0 + $0x70] sm:$0xff]  ;;  %v71_v46 = vld [vmem:[%s3867_s0 + $0x168] sm:$0xff]  ;;  %v41_v47 = vld [vmem:[%s3867_s0 + $0x78] sm:$0xff] }
   0xf   :  { %2802 = vmatprep.subr.bf16.mxu1 %v2801_v31  ;;  %v72_v48 = vld [vmem:[%s3867_s0 + $0x170] sm:$0xff]  ;;  %v42_v49 = vld [vmem:[%s3867_s0 + $0x80] sm:$0xff]  ;;  %v73_v50 = vld [vmem:[%s3867_s0 + $0x178] sm:$0xff] }
  0x10   :  { %2477 = vmatmul.mubr.msk.f32.gmra.mrb[2].mxu0 %vm101_vm0, %v29_v9  ;;  %2525 = vmatmul.mubr.msk.f32.gmra.mrb[2].mxu1 %vm101_vm0, %v61_v14  ;;  %v43_v51 = vld [vmem:[%s3867_s0 + $0x88] sm:$0xff]  ;;  %v74_v52 = vld [vmem:[%s3867_s0 + $0x180] sm:$0xff]  ;;  %v44_v53 = vld [vmem:[%s3867_s0 + $0x90] sm:$0xff] }
  0x11   :  { %2479 = vmatprep.mubr.msk.f32.mxu0 %vm101_vm0, %v30_v13  ;;  %2527 = vmatprep.mubr.msk.f32.mxu1 %vm101_vm0, %v62_v16  ;;  %v75_v54 = vld [vmem:[%s3867_s0 + $0x188] sm:$0xff]  ;;  %v45_v55 = vld [vmem:[%s3867_s0 + $0x98] sm:$0xff]  ;;  %v76_v56 = vld [vmem:[%s3867_s0 + $0x190] sm:$0xff] }
  0x12   :  { %2804 = vmatpush3.bf16.msra.mxu1 %v2801_v31  ;;  %v46_v57 = vld [vmem:[%s3867_s0 + $0xa0] sm:$0xff]  ;;  %v77_v58 = vld [vmem:[%s3867_s0 + $0x198] sm:$0xff]  ;;  %v47_v59 = vld [vmem:[%s3867_s0 + $0xa8] sm:$0xff] }
  0x13   :  { %2806 = vmatprep.subr.bf16.mxu1 %v2805_v38  ;;  %v78_v60 = vld [vmem:[%s3867_s0 + $0x1a0] sm:$0xff]  ;;  %v48_v61 = vld [vmem:[%s3867_s0 + $0xb0] sm:$0xff]  ;;  %v79_v62 = vld [vmem:[%s3867_s0 + $0x1a8] sm:$0xff] }
  0x14   :  { %2480 = vmatmul.mubr.msk.f32.gmra.mrb[4].mxu0 %vm101_vm0, %v31_v15  ;;  %2528 = vmatmul.mubr.msk.f32.gmra.mrb[4].mxu1 %vm101_vm0, %v63_v18  ;;  %v49_v63 = vld [vmem:[%s3867_s0 + $0xb8] sm:$0xff]  ;;  %v80_v0 = vld [vmem:[%s3867_s0 + $0x1b0] sm:$0xff]  ;;  %v50_v1 = vld [vmem:[%s3867_s0 + $0xc0] sm:$0xff] }
  0x15   :  { %2482 = vmatprep.mubr.msk.f32.mxu0 %vm101_vm0, %v32_v17  ;;  %2530 = vmatprep.mubr.msk.f32.mxu1 %vm101_vm0, %v64_v20  ;;  %v81_v2 = vld [vmem:[%s3867_s0 + $0x1b8] sm:$0xff]  ;;  %v51_v3 = vld [vmem:[%s3867_s0 + $0xc8] sm:$0xff]  ;;  %v82_v4 = vld [vmem:[%s3867_s0 + $0x1c0] sm:$0xff] }
  0x16   :  { %2808 = vmatpush3.bf16.msra.mxu1 %v2805_v38  ;;  %v52_v5 = vld [vmem:[%s3867_s0 + $0xd0] sm:$0xff]  ;;  %v83_v6 = vld [vmem:[%s3867_s0 + $0x1c8] sm:$0xff]  ;;  %v53_v7 = vld [vmem:[%s3867_s0 + $0xd8] sm:$0xff] }
  0x17   :  { %2810 = vmatprep.subr.bf16.mxu1 %v2809_v45  ;;  %v84_v8 = vld [vmem:[%s3867_s0 + $0x1d0] sm:$0xff]  ;;  %v54_v9 = vld [vmem:[%s3867_s0 + $0xe0] sm:$0xff]  ;;  %v85_v10 = vld [vmem:[%s3867_s0 + $0x1d8] sm:$0xff] }
  0x18   :  { %2483 = vmatmul.mubr.msk.f32.gmra.mrb[6].mxu0 %vm101_vm0, %v33_v19  ;;  %2531 = vmatmul.mubr.msk.f32.gmra.mrb[6].mxu1 %vm101_vm0, %v65_v22  ;;  %v55_v11 = vld [vmem:[%s3867_s0 + $0xe8] sm:$0xff]  ;;  %v86_v12 = vld [vmem:[%s3867_s0 + $0x1e0] sm:$0xff]  ;;  %v56_v13 = vld [vmem:[%s3867_s0 + $0xf0] sm:$0xff] }
  0x19   :  { %2485 = vmatprep.mubr.msk.f32.mxu0 %vm101_vm0, %v34_v21  ;;  %2533 = vmatprep.mubr.msk.f32.mxu1 %vm101_vm0, %v66_v28  ;;  %v87_v14 = vld [vmem:[%s3867_s0 + $0x1e8] sm:$0xff]  ;;  %v57_v15 = vld [vmem:[%s3867_s0 + $0xf8] sm:$0xff]  ;;  %v88_v16 = vld [vmem:[%s3867_s0 + $0x1f0] sm:$0xff] }
  0x1a   :  { %2812 = vmatpush3.bf16.msra.mxu1 %v2809_v45  ;;  %v89_v17 = vld [vmem:[%s3867_s0 + $0x1f8] sm:$0xff]  ;;  %v3164_v18 = vld [vmem:[%s3869_s2] ss:$0 sm:$0xff]  ;;  %v1401_v29 = vld [vmem:[%s3870_s5 + $0x8] sm:$0xff] }
  0x1b   :  { %v1400_v28 = vld [vmem:[%s3870_s5] sm:$0xff]  ;;  %v1405_v39 = vld [vmem:[%s3870_s5 + $0x28] sm:$0xff] }
  0x1c   :  { %2486 = vmatmul.mubr.msk.f32.gmra.mrb[8].mxu0 %vm101_vm0, %v35_v27  ;;  %2534 = vmatmul.mubr.msk.f32.gmra.mrb[8].mxu1 %vm101_vm0, %v67_v34  ;;  %v2813_v34 = vpack.c.bf16 %v1401_v29, %v1400_v28  ;;  %v1404_v38 = vld [vmem:[%s3870_s5 + $0x20] sm:$0xff] }
  0x1d   :  { %2488 = vmatprep.mubr.msk.f32.mxu0 %vm101_vm0, %v36_v30  ;;  %2536 = vmatprep.mubr.msk.f32.mxu1 %vm101_vm0, %v68_v36  ;;  %v1402_v30 = vld [vmem:[%s3870_s5 + $0x10] sm:$0xff] }
  0x1e   :  { %2814 = vmatprep.subr.bf16.mxu0 %v2813_v34 }
  0x1f   :  { %2816 = vmatpush3.bf16.msra.mxu0 %v2813_v34 }
  0x20   :  { %2489 = vmatmul.mubr.msk.f32.gmra.mrb[10].mxu0 %vm101_vm0, %v37_v35  ;;  %2537 = vmatmul.mubr.msk.f32.gmra.mrb[10].mxu1 %vm101_vm0, %v69_v41  ;;  %v1403_v35 = vld [vmem:[%s3870_s5 + $0x18] sm:$0xff] }
  0x21   :  { %2491 = vmatprep.mubr.msk.f32.mxu0 %vm101_vm0, %v38_v37  ;;  %2539 = vmatprep.mubr.msk.f32.mxu1 %vm101_vm0, %v70_v43  ;;  %v2817_v37 = vpack.c.bf16 %v1403_v35, %v1402_v30 }
  0x23   :  { %2818 = vmatprep.subr.bf16.mxu0 %v2817_v37 }
  0x24   :  { %2492 = vmatmul.mubr.msk.f32.gmra.mrb[12].mxu0 %vm101_vm0, %v39_v42  ;;  %2540 = vmatmul.mubr.msk.f32.gmra.mrb[12].mxu1 %vm101_vm0, %v71_v46 }
  0x25   :  { %2494 = vmatprep.mubr.msk.f32.mxu0 %vm101_vm0, %v40_v44  ;;  %2542 = vmatprep.mubr.msk.f32.mxu1 %vm101_vm0, %v72_v48 }
  0x26   :  { %2820 = vmatpush3.bf16.msra.mxu0 %v2817_v37 }
  0x28   :  { %2495 = vmatmul.mubr.msk.f32.gmra.mrb[14].mxu0 %vm101_vm0, %v41_v47  ;;  %2543 = vmatmul.mubr.msk.f32.gmra.mrb[14].mxu1 %vm101_vm0, %v73_v50 }
  0x29   :  { %2497 = vmatprep.mubr.msk.f32.mxu0 %vm101_vm0, %v42_v49  ;;  %2545 = vmatprep.mubr.msk.f32.mxu1 %vm101_vm0, %v74_v52  ;;  %v2821_v49 = vpack.c.bf16 %v1405_v39, %v1404_v38 }
  0x2b   :  { %2822 = vmatprep.subr.bf16.mxu0 %v2821_v49 }
  0x2c   :  { %2498 = vmatmul.mubr.msk.f32.gmra.mrb[16].mxu0 %vm101_vm0, %v43_v51  ;;  %2546 = vmatmul.mubr.msk.f32.gmra.mrb[16].mxu1 %vm101_vm0, %v75_v54 }
  0x2d   :  { %2500 = vmatprep.mubr.msk.f32.mxu0 %vm101_vm0, %v44_v53  ;;  %2548 = vmatprep.mubr.msk.f32.mxu1 %vm101_vm0, %v76_v56 }
  0x2e   :  { %2824 = vmatpush3.bf16.msra.mxu0 %v2821_v49 }
  0x30   :  { %2501 = vmatmul.mubr.msk.f32.gmra.mrb[18].mxu0 %vm101_vm0, %v45_v55  ;;  %2549 = vmatmul.mubr.msk.f32.gmra.mrb[18].mxu1 %vm101_vm0, %v77_v58 }
  0x31   :  { %2503 = vmatprep.mubr.msk.f32.mxu0 %vm101_vm0, %v46_v57  ;;  %2551 = vmatprep.mubr.msk.f32.mxu1 %vm101_vm0, %v78_v60 }
  0x34   :  { %2504 = vmatmul.mubr.msk.f32.gmra.mrb[20].mxu0 %vm101_vm0, %v47_v59  ;;  %2552 = vmatmul.mubr.msk.f32.gmra.mrb[20].mxu1 %vm101_vm0, %v79_v62 }
  0x35   :  { %2506 = vmatprep.mubr.msk.f32.mxu0 %vm101_vm0, %v48_v61  ;;  %2554 = vmatprep.mubr.msk.f32.mxu1 %vm101_vm0, %v80_v0 }
  0x38   :  { %2507 = vmatmul.mubr.msk.f32.gmra.mrb[22].mxu0 %vm101_vm0, %v49_v63  ;;  %2555 = vmatmul.mubr.msk.f32.gmra.mrb[22].mxu1 %vm101_vm0, %v81_v2 }
  0x39   :  { %2509 = vmatprep.mubr.msk.f32.mxu0 %vm101_vm0, %v50_v1  ;;  %2557 = vmatprep.mubr.msk.f32.mxu1 %vm101_vm0, %v82_v4 }
  0x3c   :  { %2510 = vmatmul.mubr.msk.f32.gmra.mrb[24].mxu0 %vm101_vm0, %v51_v3  ;;  %2558 = vmatmul.mubr.msk.f32.gmra.mrb[24].mxu1 %vm101_vm0, %v83_v6 }
  0x3d   :  { %2512 = vmatprep.mubr.msk.f32.mxu0 %vm101_vm0, %v52_v5  ;;  %2560 = vmatprep.mubr.msk.f32.mxu1 %vm101_vm0, %v84_v8 }
  0x40   :  { %2513 = vmatmul.mubr.msk.f32.gmra.mrb[26].mxu0 %vm101_vm0, %v53_v7  ;;  %2561 = vmatmul.mubr.msk.f32.gmra.mrb[26].mxu1 %vm101_vm0, %v85_v10 }
  0x41   :  { %2515 = vmatprep.mubr.msk.f32.mxu0 %vm101_vm0, %v54_v9  ;;  %2563 = vmatprep.mubr.msk.f32.mxu1 %vm101_vm0, %v86_v12 }
  0x44   :  { %2516 = vmatmul.mubr.msk.f32.gmra.mrb[28].mxu0 %vm101_vm0, %v55_v11  ;;  %2564 = vmatmul.mubr.msk.f32.gmra.mrb[28].mxu1 %vm101_vm0, %v87_v14 }
  0x45   :  { %2518 = vmatprep.mubr.msk.f32.mxu0 %vm101_vm0, %v56_v13  ;;  %2566 = vmatprep.mubr.msk.f32.mxu1 %vm101_vm0, %v88_v16 }
  0x48   :  { %2519 = vmatmul.mubr.msk.f32.gmra.mrb[30].mxu0 %vm101_vm0, %v57_v15  ;;  %2567 = vmatmul.mubr.msk.f32.gmra.mrb[30].mxu1 %vm101_vm0, %v89_v17 }
  0xdf   :  { %v2475_v19 = vpop.f32.mrb[0].mxu0  ;;  %v2523_v23 = vpop.f32.mrb[0].mxu1 }
  0xe0   :  { %v366_v20 = vadd.f32 %v2475_v19, %v3164_v18  ;;  %v360_v21 = vpop.f32.mrb[1].mxu0  ;;  %v3169_v26 = vadd.f32 %v2523_v23, %v3164_v18  ;;  %v3171_v27 = vpop.f32.mrb[1].mxu1 }
  0xe1   :  { %v361_v22 = vadd.f32 %v3164_v18, %v360_v21 }
  0xe2   :  { %v680_v31 = vmax.f32 %v366_v20, 0.0 }
  0xe3   :  { %v679_v24 = vmax.f32 %v361_v22, 0.0  ;;  %v2478_v25 = vpop.f32.mrb[2].mxu0  ;;  %v2526_v40 = vpop.f32.mrb[2].mxu1 }
  0xe4   :  { %v376_v32 = vadd.f32 %v2478_v25, %v3164_v18  ;;  %v370_v33 = vpop.f32.mrb[3].mxu0  ;;  %v3196_v43 = vadd.f32 %v2526_v40, %v3164_v18  ;;  %v530_v44 = vpop.f32.mrb[3].mxu1 }
  0xe5   :  { %v371_v36 = vadd.f32 %v3164_v18, %v370_v33  ;;  %2585 = vmatprep.mubr.msk.f32.mxu1 %vm758_vm1, %v679_v24  ;;  %v3200_v48 = vadd.f32 %v3164_v18, %v530_v44 }
  0xe6   :  { %2586 = vmatmul.mubr.msk.f32.vlgmr.msra.gmra.mrb[32].mxu1 %vm758_vm1, %v680_v31  ;;  %v682_v45 = vmax.f32 %v376_v32, 0.0 }
  0xe7   :  { %v681_v41 = vmax.f32 %v371_v36, 0.0  ;;  %v2481_v42 = vpop.f32.mrb[4].mxu0  ;;  %v2529_v51 = vpop.f32.mrb[4].mxu1 }
  0xe8   :  { %v386_v46 = vadd.f32 %v2481_v42, %v3164_v18  ;;  %v380_v47 = vpop.f32.mrb[5].mxu0  ;;  %v3206_v54 = vadd.f32 %v2529_v51, %v3164_v18  ;;  %v540_v55 = vpop.f32.mrb[5].mxu1 }
  0xe9   :  { %v381_v50 = vadd.f32 %v3164_v18, %v380_v47  ;;  %2588 = vmatprep.mubr.msk.f32.mxu1 %vm758_vm1, %v681_v41  ;;  %v3210_v59 = vadd.f32 %v3164_v18, %v540_v55 }
  0xea   :  { %2589 = vmatmul.mubr.msk.f32.gmra.mrb[34].mxu1 %vm758_vm1, %v682_v45  ;;  %v684_v56 = vmax.f32 %v386_v46, 0.0 }
  0xeb   :  { %v683_v52 = vmax.f32 %v381_v50, 0.0  ;;  %v2484_v53 = vpop.f32.mrb[6].mxu0  ;;  %v2532_v61 = vpop.f32.mrb[6].mxu1 }
  0xec   :  { %v396_v57 = vadd.f32 %v2484_v53, %v3164_v18  ;;  %v390_v58 = vpop.f32.mrb[7].mxu0  ;;  %v3216_v0 = vadd.f32 %v2532_v61, %v3164_v18  ;;  %v550_v1 = vpop.f32.mrb[7].mxu1 }
  0xed   :  { %v391_v60 = vadd.f32 %v3164_v18, %v390_v58  ;;  %2591 = vmatprep.mubr.msk.f32.mxu1 %vm758_vm1, %v683_v52  ;;  %v3220_v5 = vadd.f32 %v3164_v18, %v550_v1 }
  0xee   :  { %2592 = vmatmul.mubr.msk.f32.gmra.mrb[36].mxu1 %vm758_vm1, %v684_v56  ;;  %v686_v2 = vmax.f32 %v396_v57, 0.0 }
  0xef   :  { %v685_v62 = vmax.f32 %v391_v60, 0.0  ;;  %v2487_v63 = vpop.f32.mrb[8].mxu0  ;;  %v2535_v7 = vpop.f32.mrb[8].mxu1 }
  0xf0   :  { %v406_v3 = vadd.f32 %v2487_v63, %v3164_v18  ;;  %v400_v4 = vpop.f32.mrb[9].mxu0  ;;  %v3226_v10 = vadd.f32 %v2535_v7, %v3164_v18  ;;  %v560_v11 = vpop.f32.mrb[9].mxu1 }
  0xf1   :  { %v401_v6 = vadd.f32 %v3164_v18, %v400_v4  ;;  %2594 = vmatprep.mubr.msk.f32.mxu1 %vm758_vm1, %v685_v62  ;;  %v3230_v15 = vadd.f32 %v3164_v18, %v560_v11 }
  0xf2   :  { %2595 = vmatmul.mubr.msk.f32.gmra.mrb[38].mxu1 %vm758_vm1, %v686_v2  ;;  %v688_v12 = vmax.f32 %v406_v3, 0.0 }
  0xf3   :  { %v687_v8 = vmax.f32 %v401_v6, 0.0  ;;  %v2490_v9 = vpop.f32.mrb[10].mxu0  ;;  %v2538_v17 = vpop.f32.mrb[10].mxu1 }
  0xf4   :  { %v416_v13 = vadd.f32 %v2490_v9, %v3164_v18  ;;  %v410_v14 = vpop.f32.mrb[11].mxu0  ;;  %v3236_v21 = vadd.f32 %v2538_v17, %v3164_v18  ;;  %v570_v22 = vpop.f32.mrb[11].mxu1 }
  0xf5   :  { %v411_v16 = vadd.f32 %v3164_v18, %v410_v14  ;;  %2597 = vmatprep.mubr.msk.f32.mxu1 %vm758_vm1, %v687_v8  ;;  %v3240_v28 = vadd.f32 %v3164_v18, %v570_v22 }
  0xf6   :  { %2598 = vmatmul.mubr.msk.f32.gmra.mrb[40].mxu1 %vm758_vm1, %v688_v12  ;;  %v690_v23 = vmax.f32 %v416_v13, 0.0 }
  0xf7   :  { %v689_v19 = vmax.f32 %v411_v16, 0.0  ;;  %v2493_v20 = vpop.f32.mrb[12].mxu0  ;;  %v2541_v30 = vpop.f32.mrb[12].mxu1 }
  0xf8   :  { %v426_v24 = vadd.f32 %v2493_v20, %v3164_v18  ;;  %v420_v25 = vpop.f32.mrb[13].mxu0  ;;  %v3246_v33 = vadd.f32 %v2541_v30, %v3164_v18  ;;  %v580_v34 = vpop.f32.mrb[13].mxu1 }
  0xf9   :  { %v421_v29 = vadd.f32 %v3164_v18, %v420_v25  ;;  %2600 = vmatprep.mubr.msk.f32.mxu1 %vm758_vm1, %v689_v19  ;;  %v3250_v38 = vadd.f32 %v3164_v18, %v580_v34 }
  0xfa   :  { %2601 = vmatmul.mubr.msk.f32.gmra.mrb[42].mxu1 %vm758_vm1, %v690_v23  ;;  %v692_v35 = vmax.f32 %v426_v24, 0.0 }
  0xfb   :  { %v691_v31 = vmax.f32 %v421_v29, 0.0  ;;  %v2496_v32 = vpop.f32.mrb[14].mxu0  ;;  %v2544_v40 = vpop.f32.mrb[14].mxu1 }
  0xfc   :  { %v436_v36 = vadd.f32 %v2496_v32, %v3164_v18  ;;  %v430_v37 = vpop.f32.mrb[15].mxu0  ;;  %v3256_v44 = vadd.f32 %v2544_v40, %v3164_v18  ;;  %v590_v45 = vpop.f32.mrb[15].mxu1 }
  0xfd   :  { %v431_v39 = vadd.f32 %v3164_v18, %v430_v37  ;;  %2603 = vmatprep.mubr.msk.f32.mxu1 %vm758_vm1, %v691_v31  ;;  %v3260_v50 = vadd.f32 %v3164_v18, %v590_v45 }
  0xfe   :  { %2604 = vmatmul.mubr.msk.f32.gmra.mrb[44].mxu1 %vm758_vm1, %v692_v35  ;;  %v694_v46 = vmax.f32 %v436_v36, 0.0 }
  0xff   :  { %v693_v41 = vmax.f32 %v431_v39, 0.0  ;;  %v2499_v42 = vpop.f32.mrb[16].mxu0  ;;  %v2547_v52 = vpop.f32.mrb[16].mxu1 }
 0x100   :  { %v446_v47 = vadd.f32 %v2499_v42, %v3164_v18  ;;  %v440_v49 = vpop.f32.mrb[17].mxu0  ;;  %v3266_v56 = vadd.f32 %v2547_v52, %v3164_v18  ;;  %v600_v57 = vpop.f32.mrb[17].mxu1 }
 0x101   :  { %v441_v51 = vadd.f32 %v3164_v18, %v440_v49  ;;  %2606 = vmatprep.mubr.msk.f32.mxu1 %vm758_vm1, %v693_v41  ;;  %v3270_v62 = vadd.f32 %v3164_v18, %v600_v57 }
 0x102   :  { %2607 = vmatmul.mubr.msk.f32.gmra.mrb[46].mxu1 %vm758_vm1, %v694_v46  ;;  %v696_v58 = vmax.f32 %v446_v47, 0.0 }
 0x103   :  { %v695_v53 = vmax.f32 %v441_v51, 0.0  ;;  %v2502_v55 = vpop.f32.mrb[18].mxu0  ;;  %v2550_v1 = vpop.f32.mrb[18].mxu1 }
 0x104   :  { %v456_v60 = vadd.f32 %v2502_v55, %v3164_v18  ;;  %v450_v61 = vpop.f32.mrb[19].mxu0  ;;  %v3276_v4 = vadd.f32 %v2550_v1, %v3164_v18  ;;  %v610_v6 = vpop.f32.mrb[19].mxu1 }
 0x105   :  { %v451_v63 = vadd.f32 %v3164_v18, %v450_v61  ;;  %2609 = vmatprep.mubr.msk.f32.mxu1 %vm758_vm1, %v695_v53  ;;  %v3280_v11 = vadd.f32 %v3164_v18, %v610_v6 }
 0x106   :  { %2610 = vmatmul.mubr.msk.f32.gmra.mrb[48].mxu1 %vm758_vm1, %v696_v58  ;;  %v698_v7 = vmax.f32 %v456_v60, 0.0 }
 0x107   :  { %v697_v2 = vmax.f32 %v451_v63, 0.0  ;;  %v2505_v3 = vpop.f32.mrb[20].mxu0  ;;  %v2553_v13 = vpop.f32.mrb[20].mxu1 }
 0x108   :  { %v466_v8 = vadd.f32 %v2505_v3, %v3164_v18  ;;  %v460_v9 = vpop.f32.mrb[21].mxu0  ;;  %v3286_v17 = vadd.f32 %v2553_v13, %v3164_v18  ;;  %v620_v19 = vpop.f32.mrb[21].mxu1  ;;  %v521_v13 = vadd.f32 %v3164_v18, %v3171_v27 }
 0x109   :  { %v461_v12 = vadd.f32 %v3164_v18, %v460_v9  ;;  %2612 = vmatprep.mubr.msk.f32.mxu1 %vm758_vm1, %v697_v2  ;;  %v3290_v24 = vadd.f32 %v3164_v18, %v620_v19 }
 0x10a   :  { %2613 = vmatmul.mubr.msk.f32.gmra.mrb[50].mxu1 %vm758_vm1, %v698_v7  ;;  %v700_v20 = vmax.f32 %v466_v8, 0.0  ;;  %v711_v27 = vmax.f32 %v521_v13, 0.0 }
 0x10b   :  { %v699_v14 = vmax.f32 %v461_v12, 0.0  ;;  %v2508_v16 = vpop.f32.mrb[22].mxu0  ;;  %v2556_v29 = vpop.f32.mrb[22].mxu1 }
 0x10c   :  { %v476_v22 = vadd.f32 %v2508_v16, %v3164_v18  ;;  %v470_v23 = vpop.f32.mrb[23].mxu0  ;;  %v3296_v32 = vadd.f32 %v2556_v29, %v3164_v18  ;;  %v630_v34 = vpop.f32.mrb[23].mxu1 }
 0x10d   :  { %v471_v25 = vadd.f32 %v3164_v18, %v470_v23  ;;  %2615 = vmatprep.mubr.msk.f32.mxu1 %vm758_vm1, %v699_v14  ;;  %v3300_v39 = vadd.f32 %v3164_v18, %v630_v34 }
 0x10e   :  { %2616 = vmatmul.mubr.msk.f32.gmra.mrb[52].mxu1 %vm758_vm1, %v700_v20  ;;  %v702_v35 = vmax.f32 %v476_v22, 0.0 }
 0x10f   :  { %v701_v30 = vmax.f32 %v471_v25, 0.0  ;;  %v2511_v31 = vpop.f32.mrb[24].mxu0  ;;  %v2559_v41 = vpop.f32.mrb[24].mxu1 }
 0x110   :  { %v486_v36 = vadd.f32 %v2511_v31, %v3164_v18  ;;  %v480_v37 = vpop.f32.mrb[25].mxu0  ;;  %v3306_v46 = vadd.f32 %v2559_v41, %v3164_v18  ;;  %v640_v47 = vpop.f32.mrb[25].mxu1  ;;  %v715_v41 = vmax.f32 %v3210_v59, 0.0  ;;  %v718_v59 = vmax.f32 %v3216_v0, 0.0 }
 0x111   :  { %v481_v40 = vadd.f32 %v3164_v18, %v480_v37  ;;  %2618 = vmatprep.mubr.msk.f32.mxu1 %vm758_vm1, %v701_v30  ;;  %v3310_v53 = vadd.f32 %v3164_v18, %v640_v47  ;;  %v713_v37 = vmax.f32 %v3200_v48, 0.0  ;;  %v716_v48 = vmax.f32 %v3206_v54, 0.0 }
 0x112   :  { %2619 = vmatmul.mubr.msk.f32.gmra.mrb[54].mxu1 %vm758_vm1, %v702_v35  ;;  %v704_v49 = vmax.f32 %v486_v36, 0.0  ;;  %v723_v54 = vmax.f32 %v3250_v38, 0.0  ;;  %v725_v0 = vmax.f32 %v3260_v50, 0.0  ;;  %v726_v38 = vmax.f32 %v3256_v44, 0.0 }
 0x113   :  { %v703_v42 = vmax.f32 %v481_v40, 0.0  ;;  %v2514_v45 = vpop.f32.mrb[26].mxu0  ;;  %v2562_v57 = vpop.f32.mrb[26].mxu1  ;;  %v712_v40 = vmax.f32 %v3169_v26, 0.0  ;;  %v719_v26 = vmax.f32 %v3230_v15, 0.0  ;;  %v722_v15 = vmax.f32 %v3236_v21, 0.0 }
 0x114   :  { %v496_v51 = vadd.f32 %v2514_v45, %v3164_v18  ;;  %v490_v52 = vpop.f32.mrb[27].mxu0  ;;  %v3316_v61 = vadd.f32 %v2562_v57, %v3164_v18  ;;  %v650_v63 = vpop.f32.mrb[27].mxu1  ;;  %v729_v21 = vmax.f32 %v3280_v11, 0.0  ;;  %v728_v50 = vmax.f32 %v3266_v56, 0.0 }
 0x115   :  { %v491_v55 = vadd.f32 %v3164_v18, %v490_v52  ;;  %2621 = vmatprep.mubr.msk.f32.mxu1 %vm758_vm1, %v703_v42  ;;  %v3320_v6 = vadd.f32 %v3164_v18, %v650_v63  ;;  %v714_v42 = vmax.f32 %v3196_v43, 0.0  ;;  %v721_v43 = vmax.f32 %v3240_v28, 0.0 }
 0x116   :  { %2622 = vmatmul.mubr.msk.f32.gmra.mrb[56].mxu1 %vm758_vm1, %v704_v49  ;;  %v706_v1 = vmax.f32 %v496_v51, 0.0  ;;  %v724_v28 = vmax.f32 %v3246_v33, 0.0  ;;  %v731_v33 = vmax.f32 %v3290_v24, 0.0  ;;  %v733_v44 = vmax.f32 %v3300_v39, 0.0  ;;  %v3411_v49 = vld [vmem:[%s3871_s4] ss:$0 sm:$0xff] }
 0x117   :  { %v705_v58 = vmax.f32 %v491_v55, 0.0  ;;  %v2517_v60 = vpop.f32.mrb[28].mxu0  ;;  %v2565_v8 = vpop.f32.mrb[28].mxu1  ;;  %v732_v11 = vmax.f32 %v3286_v17, 0.0  ;;  %v735_v56 = vmax.f32 %v3310_v53, 0.0  ;;  %v734_v24 = vmax.f32 %v3296_v32, 0.0 }
 0x118   :  { %v506_v2 = vadd.f32 %v2517_v60, %v3164_v18  ;;  %v500_v3 = vpop.f32.mrb[29].mxu0  ;;  %v3328_v14 = vadd.f32 %v2565_v8, %v3164_v18  ;;  %v660_v16 = vpop.f32.mrb[29].mxu1  ;;  %v736_v39 = vmax.f32 %v3306_v46, 0.0  ;;  %v738_v45 = vmax.f32 %v3316_v61, 0.0 }
 0x119   :  { %v501_v7 = vadd.f32 %v3164_v18, %v500_v3  ;;  %2624 = vmatprep.mubr.msk.f32.mxu1 %vm758_vm1, %v705_v58  ;;  %v3332_v23 = vadd.f32 %v3164_v18, %v660_v16 }
 0x11a   :  { %2625 = vmatmul.mubr.msk.f32.gmra.mrb[58].mxu1 %vm758_vm1, %v706_v1  ;;  %v708_v19 = vmax.f32 %v506_v2, 0.0  ;;  %v740_v47 = vmax.f32 %v3328_v14, 0.0 }
 0x11b   :  { %v707_v9 = vmax.f32 %v501_v7, 0.0  ;;  %v2520_v12 = vpop.f32.mrb[30].mxu0  ;;  %v2568_v29 = vpop.f32.mrb[30].mxu1  ;;  %v739_v17 = vmax.f32 %v3332_v23, 0.0 }
 0x11c   :  { %v516_v20 = vadd.f32 %v2520_v12, %v3164_v18  ;;  %v510_v22 = vpop.f32.mrb[31].mxu0  ;;  %v3338_v31 = vadd.f32 %v2568_v29, %v3164_v18  ;;  %v670_v34 = vpop.f32.mrb[31].mxu1 }
 0x11d   :  { %v511_v25 = vadd.f32 %v3164_v18, %v510_v22  ;;  %2627 = vmatprep.mubr.msk.f32.mxu1 %vm758_vm1, %v707_v9  ;;  %v3341_v36 = vadd.f32 %v3164_v18, %v670_v34  ;;  %v717_v18 = vmax.f32 %v3220_v5, 0.0  ;;  %v720_v5 = vmax.f32 %v3226_v10, 0.0 }
 0x11e   :  { %2628 = vmatmul.mubr.msk.f32.gmra.mrb[60].mxu1 %vm758_vm1, %v708_v19  ;;  %v710_v35 = vmax.f32 %v516_v20, 0.0  ;;  %v727_v10 = vmax.f32 %v3270_v62, 0.0  ;;  %v730_v62 = vmax.f32 %v3276_v4, 0.0  ;;  %v737_v4 = vmax.f32 %v3320_v6, 0.0 }
 0x11f   :  { %v709_v30 = vmax.f32 %v511_v25, 0.0  ;;  %v741_v32 = vmax.f32 %v3341_v36, 0.0  ;;  %v742_v46 = vmax.f32 %v3338_v31, 0.0 }
 0x121   :  { %2630 = vmatprep.mubr.msk.f32.mxu1 %vm758_vm1, %v709_v30 }
 0x122   :  { %2631 = vmatmul.mubr.msk.f32.gmra.mrb[62].mxu1 %vm758_vm1, %v710_v35 }
 0x123   :  { %2633 = vmatprep.mubr.msk.f32.mxu1 %vm758_vm1, %v711_v27 }
 0x126   :  { %2634 = vmatmul.mubr.msk.f32.gmra.mrb[64].mxu1 %vm758_vm1, %v712_v40 }
 0x127   :  { %2636 = vmatprep.mubr.msk.f32.mxu1 %vm758_vm1, %v713_v37 }
 0x12a   :  { %2637 = vmatmul.mubr.msk.f32.gmra.mrb[66].mxu1 %vm758_vm1, %v714_v42 }
 0x12b   :  { %2639 = vmatprep.mubr.msk.f32.mxu1 %vm758_vm1, %v715_v41 }
 0x12e   :  { %2640 = vmatmul.mubr.msk.f32.gmra.mrb[68].mxu1 %vm758_vm1, %v716_v48 }
 0x12f   :  { %2642 = vmatprep.mubr.msk.f32.mxu1 %vm758_vm1, %v717_v18 }
 0x132   :  { %2643 = vmatmul.mubr.msk.f32.gmra.mrb[70].mxu1 %vm758_vm1, %v718_v59 }
 0x133   :  { %2645 = vmatprep.mubr.msk.f32.mxu1 %vm758_vm1, %v719_v26 }
 0x136   :  { %2646 = vmatmul.mubr.msk.f32.gmra.mrb[72].mxu1 %vm758_vm1, %v720_v5 }
 0x137   :  { %2648 = vmatprep.mubr.msk.f32.mxu1 %vm758_vm1, %v721_v43 }
 0x13a   :  { %2649 = vmatmul.mubr.msk.f32.gmra.mrb[74].mxu1 %vm758_vm1, %v722_v15 }
 0x13b   :  { %2651 = vmatprep.mubr.msk.f32.mxu1 %vm758_vm1, %v723_v54 }
 0x13e   :  { %2652 = vmatmul.mubr.msk.f32.gmra.mrb[76].mxu1 %vm758_vm1, %v724_v28 }
 0x13f   :  { %2654 = vmatprep.mubr.msk.f32.mxu1 %vm758_vm1, %v725_v0 }
 0x142   :  { %2655 = vmatmul.mubr.msk.f32.gmra.mrb[78].mxu1 %vm758_vm1, %v726_v38 }
 0x143   :  { %2657 = vmatprep.mubr.msk.f32.mxu1 %vm758_vm1, %v727_v10 }
 0x146   :  { %2658 = vmatmul.mubr.msk.f32.gmra.mrb[80].mxu1 %vm758_vm1, %v728_v50 }
 0x147   :  { %2660 = vmatprep.mubr.msk.f32.mxu1 %vm758_vm1, %v729_v21 }
 0x14a   :  { %2661 = vmatmul.mubr.msk.f32.gmra.mrb[82].mxu1 %vm758_vm1, %v730_v62 }
 0x14b   :  { %2663 = vmatprep.mubr.msk.f32.mxu1 %vm758_vm1, %v731_v33 }
 0x14e   :  { %2664 = vmatmul.mubr.msk.f32.gmra.mrb[84].mxu1 %vm758_vm1, %v732_v11 }
 0x14f   :  { %2666 = vmatprep.mubr.msk.f32.mxu1 %vm758_vm1, %v733_v44 }
 0x152   :  { %2667 = vmatmul.mubr.msk.f32.gmra.mrb[86].mxu1 %vm758_vm1, %v734_v24 }
 0x153   :  { %2669 = vmatprep.mubr.msk.f32.mxu1 %vm758_vm1, %v735_v56 }
 0x156   :  { %2670 = vmatmul.mubr.msk.f32.gmra.mrb[88].mxu1 %vm758_vm1, %v736_v39 }
 0x157   :  { %2672 = vmatprep.mubr.msk.f32.mxu1 %vm758_vm1, %v737_v4 }
 0x15a   :  { %2673 = vmatmul.mubr.msk.f32.gmra.mrb[90].mxu1 %vm758_vm1, %v738_v45 }
 0x15b   :  { %2675 = vmatprep.mubr.msk.f32.mxu1 %vm758_vm1, %v739_v17 }
 0x15e   :  { %2676 = vmatmul.mubr.msk.f32.gmra.mrb[92].mxu1 %vm758_vm1, %v740_v47 }
 0x15f   :  { %2678 = vmatprep.mubr.msk.f32.mxu1 %vm758_vm1, %v741_v32 }
 0x162   :  { %2679 = vmatmul.mubr.msk.f32.gmra.mrb[94].mxu1 %vm758_vm1, %v742_v46 }
 0x1b9   :  { %v2587_v51 = vpop.f32.mrb[32].mxu1 }
 0x1ba   :  { %v1023_v52 = vadd.f32 %v2587_v51, %v3411_v49  ;;  %v1017_v53 = vpop.f32.mrb[33].mxu1 }
 0x1bb   :  { %v1018_v55 = vadd.f32 %v3411_v49, %v1017_v53 }
 0x1bc   :  { %v1337_v60 = vmax.f32 %v1023_v52, 0.0 }
 0x1bd   :  { %v1336_v57 = vmax.f32 %v1018_v55, 0.0  ;;  %v2590_v58 = vpop.f32.mrb[34].mxu1 }
 0x1be   :  { %v1033_v61 = vadd.f32 %v2590_v58, %v3411_v49  ;;  %v1027_v63 = vpop.f32.mrb[35].mxu1 }
 0x1bf   :  { %v1028_v1 = vadd.f32 %v3411_v49, %v1027_v63  ;;  %2693 = vmatprep.mubr.msk.f32.mxu0 %vm1413_vm2, %v1336_v57 }
 0x1c0   :  { %2694 = vmatmul.mubr.msk.f32.vlgmr.msra.gmra.mrb[32].mxu0 %vm1413_vm2, %v1337_v60  ;;  %v1339_v6 = vmax.f32 %v1033_v61, 0.0 }
 0x1c1   :  { %v1338_v2 = vmax.f32 %v1028_v1, 0.0  ;;  %v2593_v3 = vpop.f32.mrb[36].mxu1 }
 0x1c2   :  { %v1043_v7 = vadd.f32 %v2593_v3, %v3411_v49  ;;  %v1037_v8 = vpop.f32.mrb[37].mxu1 }
 0x1c3   :  { %v1038_v9 = vadd.f32 %v3411_v49, %v1037_v8  ;;  %2696 = vmatprep.mubr.msk.f32.mxu0 %vm1413_vm2, %v1338_v2 }
 0x1c4   :  { %2697 = vmatmul.mubr.msk.f32.gmra.mrb[34].mxu0 %vm1413_vm2, %v1339_v6  ;;  %v1341_v14 = vmax.f32 %v1043_v7, 0.0 }
 0x1c5   :  { %v1340_v12 = vmax.f32 %v1038_v9, 0.0  ;;  %v2596_v13 = vpop.f32.mrb[38].mxu1 }
 0x1c6   :  { %v1053_v16 = vadd.f32 %v2596_v13, %v3411_v49  ;;  %v1047_v19 = vpop.f32.mrb[39].mxu1 }
 0x1c7   :  { %v1048_v20 = vadd.f32 %v3411_v49, %v1047_v19  ;;  %2699 = vmatprep.mubr.msk.f32.mxu0 %vm1413_vm2, %v1340_v12 }
 0x1c8   :  { %2700 = vmatmul.mubr.msk.f32.gmra.mrb[36].mxu0 %vm1413_vm2, %v1341_v14  ;;  %v1343_v25 = vmax.f32 %v1053_v16, 0.0 }
 0x1c9   :  { %v1342_v22 = vmax.f32 %v1048_v20, 0.0  ;;  %v2599_v23 = vpop.f32.mrb[40].mxu1 }
 0x1ca   :  { %v1063_v29 = vadd.f32 %v2599_v23, %v3411_v49  ;;  %v1057_v30 = vpop.f32.mrb[41].mxu1 }
 0x1cb   :  { %v1058_v27 = vadd.f32 %v3411_v49, %v1057_v30  ;;  %2702 = vmatprep.mubr.msk.f32.mxu0 %vm1413_vm2, %v1342_v22 }
 0x1cc   :  { %2703 = vmatmul.mubr.msk.f32.gmra.mrb[38].mxu0 %vm1413_vm2, %v1343_v25  ;;  %v1345_v35 = vmax.f32 %v1063_v29, 0.0 }
 0x1cd   :  { %v1344_v31 = vmax.f32 %v1058_v27, 0.0  ;;  %v2602_v34 = vpop.f32.mrb[42].mxu1 }
 0x1ce   :  { %v1073_v36 = vadd.f32 %v2602_v34, %v3411_v49  ;;  %v1067_v37 = vpop.f32.mrb[43].mxu1 }
 0x1cf   :  { %v1068_v40 = vadd.f32 %v3411_v49, %v1067_v37  ;;  %2705 = vmatprep.mubr.msk.f32.mxu0 %vm1413_vm2, %v1344_v31 }
 0x1d0   :  { %2706 = vmatmul.mubr.msk.f32.gmra.mrb[40].mxu0 %vm1413_vm2, %v1345_v35  ;;  %v1347_v18 = vmax.f32 %v1073_v36, 0.0 }
 0x1d1   :  { %v1346_v41 = vmax.f32 %v1068_v40, 0.0  ;;  %v2605_v42 = vpop.f32.mrb[44].mxu1 }
 0x1d2   :  { %v1083_v48 = vadd.f32 %v2605_v42, %v3411_v49  ;;  %v1077_v26 = vpop.f32.mrb[45].mxu1 }
 0x1d3   :  { %v1078_v59 = vadd.f32 %v3411_v49, %v1077_v26  ;;  %2708 = vmatprep.mubr.msk.f32.mxu0 %vm1413_vm2, %v1346_v41 }
 0x1d4   :  { %2709 = vmatmul.mubr.msk.f32.gmra.mrb[42].mxu0 %vm1413_vm2, %v1347_v18  ;;  %v1349_v54 = vmax.f32 %v1083_v48, 0.0 }
 0x1d5   :  { %v1348_v43 = vmax.f32 %v1078_v59, 0.0  ;;  %v2608_v5 = vpop.f32.mrb[46].mxu1 }
 0x1d6   :  { %v1093_v15 = vadd.f32 %v2608_v5, %v3411_v49  ;;  %v1087_v0 = vpop.f32.mrb[47].mxu1 }
 0x1d7   :  { %v1088_v28 = vadd.f32 %v3411_v49, %v1087_v0  ;;  %2711 = vmatprep.mubr.msk.f32.mxu0 %vm1413_vm2, %v1348_v43 }
 0x1d8   :  { %2712 = vmatmul.mubr.msk.f32.gmra.mrb[44].mxu0 %vm1413_vm2, %v1349_v54  ;;  %v1351_v21 = vmax.f32 %v1093_v15, 0.0 }
 0x1d9   :  { %v1350_v10 = vmax.f32 %v1088_v28, 0.0  ;;  %v2611_v38 = vpop.f32.mrb[48].mxu1 }
 0x1da   :  { %v1103_v50 = vadd.f32 %v2611_v38, %v3411_v49  ;;  %v1097_v33 = vpop.f32.mrb[49].mxu1 }
 0x1db   :  { %v1098_v62 = vadd.f32 %v3411_v49, %v1097_v33  ;;  %2714 = vmatprep.mubr.msk.f32.mxu0 %vm1413_vm2, %v1350_v10 }
 0x1dc   :  { %2715 = vmatmul.mubr.msk.f32.gmra.mrb[46].mxu0 %vm1413_vm2, %v1351_v21  ;;  %v1353_v56 = vmax.f32 %v1103_v50, 0.0 }
 0x1dd   :  { %v1352_v44 = vmax.f32 %v1098_v62, 0.0  ;;  %v2614_v11 = vpop.f32.mrb[50].mxu1 }
 0x1de   :  { %v1113_v24 = vadd.f32 %v2614_v11, %v3411_v49  ;;  %v1107_v4 = vpop.f32.mrb[51].mxu1 }
 0x1df   :  { %v1108_v39 = vadd.f32 %v3411_v49, %v1107_v4  ;;  %2717 = vmatprep.mubr.msk.f32.mxu0 %vm1413_vm2, %v1352_v44 }
 0x1e0   :  { %2718 = vmatmul.mubr.msk.f32.gmra.mrb[48].mxu0 %vm1413_vm2, %v1353_v56  ;;  %v1355_v32 = vmax.f32 %v1113_v24, 0.0 }
 0x1e1   :  { %v1354_v17 = vmax.f32 %v1108_v39, 0.0  ;;  %v2617_v45 = vpop.f32.mrb[52].mxu1 }
 0x1e2   :  { %v1123_v47 = vadd.f32 %v2617_v45, %v3411_v49  ;;  %v1117_v46 = vpop.f32.mrb[53].mxu1 }
 0x1e3   :  { %v1118_v51 = vadd.f32 %v3411_v49, %v1117_v46  ;;  %2720 = vmatprep.mubr.msk.f32.mxu0 %vm1413_vm2, %v1354_v17 }
 0x1e4   :  { %2721 = vmatmul.mubr.msk.f32.gmra.mrb[50].mxu0 %vm1413_vm2, %v1355_v32  ;;  %v1357_v55 = vmax.f32 %v1123_v47, 0.0 }
 0x1e5   :  { %v1356_v52 = vmax.f32 %v1118_v51, 0.0  ;;  %v2620_v53 = vpop.f32.mrb[54].mxu1 }
 0x1e6   :  { %v1133_v57 = vadd.f32 %v2620_v53, %v3411_v49  ;;  %v1127_v58 = vpop.f32.mrb[55].mxu1 }
 0x1e7   :  { %v1128_v60 = vadd.f32 %v3411_v49, %v1127_v58  ;;  %2723 = vmatprep.mubr.msk.f32.mxu0 %vm1413_vm2, %v1356_v52 }
 0x1e8   :  { %2724 = vmatmul.mubr.msk.f32.gmra.mrb[52].mxu0 %vm1413_vm2, %v1357_v55  ;;  %v1359_v1 = vmax.f32 %v1133_v57, 0.0 }
 0x1e9   :  { %v1358_v61 = vmax.f32 %v1128_v60, 0.0  ;;  %v2623_v63 = vpop.f32.mrb[56].mxu1 }
 0x1ea   :  { %v1143_v2 = vadd.f32 %v2623_v63, %v3411_v49  ;;  %v1137_v3 = vpop.f32.mrb[57].mxu1 }
 0x1eb   :  { %v1138_v6 = vadd.f32 %v3411_v49, %v1137_v3  ;;  %2726 = vmatprep.mubr.msk.f32.mxu0 %vm1413_vm2, %v1358_v61 }
 0x1ec   :  { %2727 = vmatmul.mubr.msk.f32.gmra.mrb[54].mxu0 %vm1413_vm2, %v1359_v1  ;;  %v1361_v9 = vmax.f32 %v1143_v2, 0.0 }
 0x1ed   :  { %v1360_v7 = vmax.f32 %v1138_v6, 0.0  ;;  %v2626_v8 = vpop.f32.mrb[58].mxu1 }
 0x1ee   :  { %v1153_v12 = vadd.f32 %v2626_v8, %v3411_v49  ;;  %v1147_v13 = vpop.f32.mrb[59].mxu1 }
 0x1ef   :  { %v1148_v14 = vadd.f32 %v3411_v49, %v1147_v13  ;;  %2729 = vmatprep.mubr.msk.f32.mxu0 %vm1413_vm2, %v1360_v7 }
 0x1f0   :  { %2730 = vmatmul.mubr.msk.f32.gmra.mrb[56].mxu0 %vm1413_vm2, %v1361_v9  ;;  %v1363_v20 = vmax.f32 %v1153_v12, 0.0 }
 0x1f1   :  { %v1362_v16 = vmax.f32 %v1148_v14, 0.0  ;;  %v2629_v19 = vpop.f32.mrb[60].mxu1 }
 0x1f2   :  { %v1163_v22 = vadd.f32 %v2629_v19, %v3411_v49  ;;  %v1157_v23 = vpop.f32.mrb[61].mxu1 }
 0x1f3   :  { %v1158_v25 = vadd.f32 %v3411_v49, %v1157_v23  ;;  %2732 = vmatprep.mubr.msk.f32.mxu0 %vm1413_vm2, %v1362_v16 }
 0x1f4   :  { %2733 = vmatmul.mubr.msk.f32.gmra.mrb[58].mxu0 %vm1413_vm2, %v1363_v20  ;;  %v1365_v27 = vmax.f32 %v1163_v22, 0.0 }
 0x1f5   :  { %v1364_v29 = vmax.f32 %v1158_v25, 0.0  ;;  %v2632_v30 = vpop.f32.mrb[62].mxu1 }
 0x1f6   :  { %v1173_v31 = vadd.f32 %v2632_v30, %v3411_v49  ;;  %v1167_v34 = vpop.f32.mrb[63].mxu1 }
 0x1f7   :  { %v1168_v35 = vadd.f32 %v3411_v49, %v1167_v34  ;;  %2735 = vmatprep.mubr.msk.f32.mxu0 %vm1413_vm2, %v1364_v29 }
 0x1f8   :  { %2736 = vmatmul.mubr.msk.f32.gmra.mrb[60].mxu0 %vm1413_vm2, %v1365_v27  ;;  %v1367_v40 = vmax.f32 %v1173_v31, 0.0 }
 0x1f9   :  { %v1366_v36 = vmax.f32 %v1168_v35, 0.0  ;;  %v2635_v37 = vpop.f32.mrb[64].mxu1 }
 0x1fa   :  { %v1183_v41 = vadd.f32 %v2635_v37, %v3411_v49  ;;  %v1177_v42 = vpop.f32.mrb[65].mxu1 }
 0x1fb   :  { %v1178_v18 = vadd.f32 %v3411_v49, %v1177_v42  ;;  %2738 = vmatprep.mubr.msk.f32.mxu0 %vm1413_vm2, %v1366_v36 }
 0x1fc   :  { %2739 = vmatmul.mubr.msk.f32.gmra.mrb[62].mxu0 %vm1413_vm2, %v1367_v40  ;;  %v1369_v59 = vmax.f32 %v1183_v41, 0.0 }
 0x1fd   :  { %v1368_v48 = vmax.f32 %v1178_v18, 0.0  ;;  %v2638_v26 = vpop.f32.mrb[66].mxu1 }
 0x1fe   :  { %v1193_v43 = vadd.f32 %v2638_v26, %v3411_v49  ;;  %v1187_v5 = vpop.f32.mrb[67].mxu1 }
 0x1ff   :  { %v1188_v54 = vadd.f32 %v3411_v49, %v1187_v5  ;;  %2741 = vmatprep.mubr.msk.f32.mxu0 %vm1413_vm2, %v1368_v48 }
 0x200   :  { %2742 = vmatmul.mubr.msk.f32.gmra.mrb[64].mxu0 %vm1413_vm2, %v1369_v59  ;;  %v1371_v28 = vmax.f32 %v1193_v43, 0.0 }
 0x201   :  { %v1370_v15 = vmax.f32 %v1188_v54, 0.0  ;;  %v2641_v0 = vpop.f32.mrb[68].mxu1 }
 0x202   :  { %v1203_v10 = vadd.f32 %v2641_v0, %v3411_v49  ;;  %v1197_v38 = vpop.f32.mrb[69].mxu1 }
 0x203   :  { %v1198_v21 = vadd.f32 %v3411_v49, %v1197_v38  ;;  %2744 = vmatprep.mubr.msk.f32.mxu0 %vm1413_vm2, %v1370_v15 }
 0x204   :  { %2745 = vmatmul.mubr.msk.f32.gmra.mrb[66].mxu0 %vm1413_vm2, %v1371_v28  ;;  %v1373_v62 = vmax.f32 %v1203_v10, 0.0 }
 0x205   :  { %v1372_v50 = vmax.f32 %v1198_v21, 0.0  ;;  %v2644_v33 = vpop.f32.mrb[70].mxu1 }
 0x206   :  { %v1213_v44 = vadd.f32 %v2644_v33, %v3411_v49  ;;  %v1207_v11 = vpop.f32.mrb[71].mxu1 }
 0x207   :  { %v1208_v56 = vadd.f32 %v3411_v49, %v1207_v11  ;;  %2747 = vmatprep.mubr.msk.f32.mxu0 %vm1413_vm2, %v1372_v50 }
 0x208   :  { %2748 = vmatmul.mubr.msk.f32.gmra.mrb[68].mxu0 %vm1413_vm2, %v1373_v62  ;;  %v1375_v39 = vmax.f32 %v1213_v44, 0.0 }
 0x209   :  { %v1374_v24 = vmax.f32 %v1208_v56, 0.0  ;;  %v2647_v4 = vpop.f32.mrb[72].mxu1 }
 0x20a   :  { %v1223_v17 = vadd.f32 %v2647_v4, %v3411_v49  ;;  %v1217_v45 = vpop.f32.mrb[73].mxu1 }
 0x20b   :  { %v1218_v32 = vadd.f32 %v3411_v49, %v1217_v45  ;;  %2750 = vmatprep.mubr.msk.f32.mxu0 %vm1413_vm2, %v1374_v24 }
 0x20c   :  { %2751 = vmatmul.mubr.msk.f32.gmra.mrb[70].mxu0 %vm1413_vm2, %v1375_v39  ;;  %v1377_v51 = vmax.f32 %v1223_v17, 0.0 }
 0x20d   :  { %v1376_v47 = vmax.f32 %v1218_v32, 0.0  ;;  %v2650_v46 = vpop.f32.mrb[74].mxu1 }
 0x20e   :  { %v1233_v52 = vadd.f32 %v2650_v46, %v3411_v49  ;;  %v1227_v53 = vpop.f32.mrb[75].mxu1 }
 0x20f   :  { %v1228_v55 = vadd.f32 %v3411_v49, %v1227_v53  ;;  %2753 = vmatprep.mubr.msk.f32.mxu0 %vm1413_vm2, %v1376_v47 }
 0x210   :  { %2754 = vmatmul.mubr.msk.f32.gmra.mrb[72].mxu0 %vm1413_vm2, %v1377_v51  ;;  %v1379_v60 = vmax.f32 %v1233_v52, 0.0 }
 0x211   :  { %v1378_v57 = vmax.f32 %v1228_v55, 0.0  ;;  %v2653_v58 = vpop.f32.mrb[76].mxu1  ;;  %v3544_v55 = vld [vmem:[%s3872_s6] ss:$0 sm:$0xff] }
 0x212   :  { %v1243_v61 = vadd.f32 %v2653_v58, %v3411_v49  ;;  %v1237_v63 = vpop.f32.mrb[77].mxu1 }
 0x213   :  { %v1238_v1 = vadd.f32 %v3411_v49, %v1237_v63  ;;  %2756 = vmatprep.mubr.msk.f32.mxu0 %vm1413_vm2, %v1378_v57 }
 0x214   :  { %2757 = vmatmul.mubr.msk.f32.gmra.mrb[74].mxu0 %vm1413_vm2, %v1379_v60  ;;  %v1381_v6 = vmax.f32 %v1243_v61, 0.0 }
 0x215   :  { %v1380_v2 = vmax.f32 %v1238_v1, 0.0  ;;  %v2656_v3 = vpop.f32.mrb[78].mxu1 }
 0x216   :  { %v1253_v7 = vadd.f32 %v2656_v3, %v3411_v49  ;;  %v1247_v8 = vpop.f32.mrb[79].mxu1 }
 0x217   :  { %v1248_v9 = vadd.f32 %v3411_v49, %v1247_v8  ;;  %2759 = vmatprep.mubr.msk.f32.mxu0 %vm1413_vm2, %v1380_v2 }
 0x218   :  { %2760 = vmatmul.mubr.msk.f32.gmra.mrb[76].mxu0 %vm1413_vm2, %v1381_v6  ;;  %v1383_v14 = vmax.f32 %v1253_v7, 0.0 }
 0x219   :  { %v1382_v12 = vmax.f32 %v1248_v9, 0.0  ;;  %v2659_v13 = vpop.f32.mrb[80].mxu1 }
 0x21a   :  { %v1263_v16 = vadd.f32 %v2659_v13, %v3411_v49  ;;  %v1257_v19 = vpop.f32.mrb[81].mxu1 }
 0x21b   :  { %v1258_v20 = vadd.f32 %v3411_v49, %v1257_v19  ;;  %2762 = vmatprep.mubr.msk.f32.mxu0 %vm1413_vm2, %v1382_v12 }
 0x21c   :  { %2763 = vmatmul.mubr.msk.f32.gmra.mrb[78].mxu0 %vm1413_vm2, %v1383_v14  ;;  %v1385_v25 = vmax.f32 %v1263_v16, 0.0 }
 0x21d   :  { %v1384_v22 = vmax.f32 %v1258_v20, 0.0  ;;  %v2662_v23 = vpop.f32.mrb[82].mxu1 }
 0x21e   :  { %v1273_v29 = vadd.f32 %v2662_v23, %v3411_v49  ;;  %v1267_v30 = vpop.f32.mrb[83].mxu1 }
 0x21f   :  { %v1268_v27 = vadd.f32 %v3411_v49, %v1267_v30  ;;  %2765 = vmatprep.mubr.msk.f32.mxu0 %vm1413_vm2, %v1384_v22 }
 0x220   :  { %2766 = vmatmul.mubr.msk.f32.gmra.mrb[80].mxu0 %vm1413_vm2, %v1385_v25  ;;  %v1387_v35 = vmax.f32 %v1273_v29, 0.0 }
 0x221   :  { %v1386_v31 = vmax.f32 %v1268_v27, 0.0  ;;  %v2665_v34 = vpop.f32.mrb[84].mxu1 }
 0x222   :  { %v1283_v36 = vadd.f32 %v2665_v34, %v3411_v49  ;;  %v1277_v37 = vpop.f32.mrb[85].mxu1 }
 0x223   :  { %v1278_v40 = vadd.f32 %v3411_v49, %v1277_v37  ;;  %2768 = vmatprep.mubr.msk.f32.mxu0 %vm1413_vm2, %v1386_v31 }
 0x224   :  { %2769 = vmatmul.mubr.msk.f32.gmra.mrb[82].mxu0 %vm1413_vm2, %v1387_v35  ;;  %v1389_v18 = vmax.f32 %v1283_v36, 0.0 }
 0x225   :  { %v1388_v41 = vmax.f32 %v1278_v40, 0.0  ;;  %v2668_v42 = vpop.f32.mrb[86].mxu1 }
 0x226   :  { %v1293_v48 = vadd.f32 %v2668_v42, %v3411_v49  ;;  %v1287_v26 = vpop.f32.mrb[87].mxu1 }
 0x227   :  { %v1288_v59 = vadd.f32 %v3411_v49, %v1287_v26  ;;  %2771 = vmatprep.mubr.msk.f32.mxu0 %vm1413_vm2, %v1388_v41 }
 0x228   :  { %2772 = vmatmul.mubr.msk.f32.gmra.mrb[84].mxu0 %vm1413_vm2, %v1389_v18  ;;  %v1391_v54 = vmax.f32 %v1293_v48, 0.0 }
 0x229   :  { %v1390_v43 = vmax.f32 %v1288_v59, 0.0  ;;  %v2671_v5 = vpop.f32.mrb[88].mxu1 }
 0x22a   :  { %v1303_v15 = vadd.f32 %v2671_v5, %v3411_v49  ;;  %v1297_v0 = vpop.f32.mrb[89].mxu1 }
 0x22b   :  { %v1298_v28 = vadd.f32 %v3411_v49, %v1297_v0  ;;  %2774 = vmatprep.mubr.msk.f32.mxu0 %vm1413_vm2, %v1390_v43 }
 0x22c   :  { %2775 = vmatmul.mubr.msk.f32.gmra.mrb[86].mxu0 %vm1413_vm2, %v1391_v54  ;;  %v1393_v21 = vmax.f32 %v1303_v15, 0.0 }
 0x22d   :  { %v1392_v10 = vmax.f32 %v1298_v28, 0.0  ;;  %v2674_v38 = vpop.f32.mrb[90].mxu1 }
 0x22e   :  { %v1313_v50 = vadd.f32 %v2674_v38, %v3411_v49  ;;  %v1307_v33 = vpop.f32.mrb[91].mxu1 }
 0x22f   :  { %v1308_v62 = vadd.f32 %v3411_v49, %v1307_v33  ;;  %2777 = vmatprep.mubr.msk.f32.mxu0 %vm1413_vm2, %v1392_v10 }
 0x230   :  { %2778 = vmatmul.mubr.msk.f32.gmra.mrb[88].mxu0 %vm1413_vm2, %v1393_v21  ;;  %v1395_v56 = vmax.f32 %v1313_v50, 0.0 }
 0x231   :  { %v1394_v44 = vmax.f32 %v1308_v62, 0.0  ;;  %v2677_v11 = vpop.f32.mrb[92].mxu1 }
 0x232   :  { %v1323_v24 = vadd.f32 %v2677_v11, %v3411_v49  ;;  %v1317_v4 = vpop.f32.mrb[93].mxu1 }
 0x233   :  { %v1318_v39 = vadd.f32 %v3411_v49, %v1317_v4  ;;  %2780 = vmatprep.mubr.msk.f32.mxu0 %vm1413_vm2, %v1394_v44 }
 0x234   :  { %2781 = vmatmul.mubr.msk.f32.gmra.mrb[90].mxu0 %vm1413_vm2, %v1395_v56  ;;  %v1397_v32 = vmax.f32 %v1323_v24, 0.0 }
 0x235   :  { %v1396_v17 = vmax.f32 %v1318_v39, 0.0  ;;  %v2680_v45 = vpop.f32.mrb[94].mxu1 }
 0x236   :  { %v1333_v47 = vadd.f32 %v2680_v45, %v3411_v49  ;;  %v1327_v46 = vpop.f32.mrb[95].mxu1 }
 0x237   :  { %v1328_v51 = vadd.f32 %v3411_v49, %v1327_v46  ;;  %2783 = vmatprep.mubr.msk.f32.mxu0 %vm1413_vm2, %v1396_v17 }
 0x238   :  { %2784 = vmatmul.mubr.msk.f32.gmra.mrb[92].mxu0 %vm1413_vm2, %v1397_v32  ;;  %v1399_v53 = vmax.f32 %v1333_v47, 0.0 }
 0x239   :  { %v1398_v52 = vmax.f32 %v1328_v51, 0.0 }
 0x23b   :  { %2786 = vmatprep.mubr.msk.f32.mxu0 %vm1413_vm2, %v1398_v52 }
 0x23c   :  { %2787 = vmatmul.mubr.msk.f32.gmra.mrb[94].mxu0 %vm1413_vm2, %v1399_v53 }
 0x293   :  { %v2695_v57 = vpop.f32.mrb[32].mxu0 }
 0x294   :  { %v1678_v58 = vadd.f32 %v2695_v57, %v3544_v55  ;;  %v1672_v49 = vpop.f32.mrb[33].mxu0 }
 0x295   :  { %v1673_v60 = vadd.f32 %v3544_v55, %v1672_v49 }
 0x296   :  { %1993 = vst.msk [vmem:[%s3873_s7 + $0x8] sm:$0xff] %vm1991_vm3, %v1678_v58 }
 0x297   :  { %1992 = vst.msk [vmem:[%s3873_s7] sm:$0xff] %vm1991_vm3, %v1673_v60  ;;  %v2698_v61 = vpop.f32.mrb[34].mxu0 }
 0x298   :  { %v1688_v63 = vadd.f32 %v2698_v61, %v3544_v55  ;;  %v1682_v1 = vpop.f32.mrb[35].mxu0 }
 0x299   :  { %v1683_v2 = vadd.f32 %v3544_v55, %v1682_v1 }
 0x29a   :  { %1995 = vst.msk [vmem:[%s3873_s7 + $0x18] sm:$0xff] %vm1991_vm3, %v1688_v63 }
 0x29b   :  { %1994 = vst.msk [vmem:[%s3873_s7 + $0x10] sm:$0xff] %vm1991_vm3, %v1683_v2  ;;  %v2701_v3 = vpop.f32.mrb[36].mxu0 }
 0x29c   :  { %v1698_v6 = vadd.f32 %v2701_v3, %v3544_v55  ;;  %v1692_v7 = vpop.f32.mrb[37].mxu0 }
 0x29d   :  { %v1693_v8 = vadd.f32 %v3544_v55, %v1692_v7 }
 0x29e   :  { %1997 = vst.msk [vmem:[%s3873_s7 + $0x28] sm:$0xff] %vm1991_vm3, %v1698_v6 }
 0x29f   :  { %1996 = vst.msk [vmem:[%s3873_s7 + $0x20] sm:$0xff] %vm1991_vm3, %v1693_v8  ;;  %v2704_v9 = vpop.f32.mrb[38].mxu0 }
 0x2a0   :  { %v1708_v12 = vadd.f32 %v2704_v9, %v3544_v55  ;;  %v1702_v13 = vpop.f32.mrb[39].mxu0 }
 0x2a1   :  { %v1703_v14 = vadd.f32 %v3544_v55, %v1702_v13 }
 0x2a2   :  { %1999 = vst.msk [vmem:[%s3873_s7 + $0x38] sm:$0xff] %vm1991_vm3, %v1708_v12 }
 0x2a3   :  { %1998 = vst.msk [vmem:[%s3873_s7 + $0x30] sm:$0xff] %vm1991_vm3, %v1703_v14  ;;  %v2707_v16 = vpop.f32.mrb[40].mxu0 }
 0x2a4   :  { %v1718_v19 = vadd.f32 %v2707_v16, %v3544_v55  ;;  %v1712_v20 = vpop.f32.mrb[41].mxu0 }
 0x2a5   :  { %v1713_v22 = vadd.f32 %v3544_v55, %v1712_v20 }
 0x2a6   :  { %2001 = vst.msk [vmem:[%s3873_s7 + $0x48] sm:$0xff] %vm1991_vm3, %v1718_v19 }
 0x2a7   :  { %2000 = vst.msk [vmem:[%s3873_s7 + $0x40] sm:$0xff] %vm1991_vm3, %v1713_v22  ;;  %v2710_v23 = vpop.f32.mrb[42].mxu0 }
 0x2a8   :  { %v1728_v25 = vadd.f32 %v2710_v23, %v3544_v55  ;;  %v1722_v29 = vpop.f32.mrb[43].mxu0 }
 0x2a9   :  { %v1723_v30 = vadd.f32 %v3544_v55, %v1722_v29 }
 0x2aa   :  { %2003 = vst.msk [vmem:[%s3873_s7 + $0x58] sm:$0xff] %vm1991_vm3, %v1728_v25 }
 0x2ab   :  { %2002 = vst.msk [vmem:[%s3873_s7 + $0x50] sm:$0xff] %vm1991_vm3, %v1723_v30  ;;  %v2713_v27 = vpop.f32.mrb[44].mxu0 }
 0x2ac   :  { %v1738_v31 = vadd.f32 %v2713_v27, %v3544_v55  ;;  %v1732_v34 = vpop.f32.mrb[45].mxu0 }
 0x2ad   :  { %v1733_v35 = vadd.f32 %v3544_v55, %v1732_v34 }
 0x2ae   :  { %2005 = vst.msk [vmem:[%s3873_s7 + $0x68] sm:$0xff] %vm1991_vm3, %v1738_v31 }
 0x2af   :  { %2004 = vst.msk [vmem:[%s3873_s7 + $0x60] sm:$0xff] %vm1991_vm3, %v1733_v35  ;;  %v2716_v36 = vpop.f32.mrb[46].mxu0 }
 0x2b0   :  { %v1748_v37 = vadd.f32 %v2716_v36, %v3544_v55  ;;  %v1742_v40 = vpop.f32.mrb[47].mxu0 }
 0x2b1   :  { %v1743_v41 = vadd.f32 %v3544_v55, %v1742_v40 }
 0x2b2   :  { %2007 = vst.msk [vmem:[%s3873_s7 + $0x78] sm:$0xff] %vm1991_vm3, %v1748_v37 }
 0x2b3   :  { %2006 = vst.msk [vmem:[%s3873_s7 + $0x70] sm:$0xff] %vm1991_vm3, %v1743_v41  ;;  %v2719_v42 = vpop.f32.mrb[48].mxu0 }
 0x2b4   :  { %v1758_v18 = vadd.f32 %v2719_v42, %v3544_v55  ;;  %v1752_v48 = vpop.f32.mrb[49].mxu0 }
 0x2b5   :  { %v1753_v26 = vadd.f32 %v3544_v55, %v1752_v48 }
 0x2b6   :  { %2009 = vst.msk [vmem:[%s3873_s7 + $0x88] sm:$0xff] %vm1991_vm3, %v1758_v18 }
 0x2b7   :  { %2008 = vst.msk [vmem:[%s3873_s7 + $0x80] sm:$0xff] %vm1991_vm3, %v1753_v26  ;;  %v2722_v59 = vpop.f32.mrb[50].mxu0 }
 0x2b8   :  { %v1768_v43 = vadd.f32 %v2722_v59, %v3544_v55  ;;  %v1762_v5 = vpop.f32.mrb[51].mxu0 }
 0x2b9   :  { %v1763_v54 = vadd.f32 %v3544_v55, %v1762_v5 }
 0x2ba   :  { %2011 = vst.msk [vmem:[%s3873_s7 + $0x98] sm:$0xff] %vm1991_vm3, %v1768_v43 }
 0x2bb   :  { %2010 = vst.msk [vmem:[%s3873_s7 + $0x90] sm:$0xff] %vm1991_vm3, %v1763_v54  ;;  %v2725_v15 = vpop.f32.mrb[52].mxu0 }
 0x2bc   :  { %v1778_v0 = vadd.f32 %v2725_v15, %v3544_v55  ;;  %v1772_v28 = vpop.f32.mrb[53].mxu0 }
 0x2bd   :  { %v1773_v10 = vadd.f32 %v3544_v55, %v1772_v28 }
 0x2be   :  { %2013 = vst.msk [vmem:[%s3873_s7 + $0xa8] sm:$0xff] %vm1991_vm3, %v1778_v0 }
 0x2bf   :  { %2012 = vst.msk [vmem:[%s3873_s7 + $0xa0] sm:$0xff] %vm1991_vm3, %v1773_v10  ;;  %v2728_v38 = vpop.f32.mrb[54].mxu0 }
 0x2c0   :  { %v1788_v21 = vadd.f32 %v2728_v38, %v3544_v55  ;;  %v1782_v50 = vpop.f32.mrb[55].mxu0 }
 0x2c1   :  { %v1783_v33 = vadd.f32 %v3544_v55, %v1782_v50 }
 0x2c2   :  { %2015 = vst.msk [vmem:[%s3873_s7 + $0xb8] sm:$0xff] %vm1991_vm3, %v1788_v21 }
 0x2c3   :  { %2014 = vst.msk [vmem:[%s3873_s7 + $0xb0] sm:$0xff] %vm1991_vm3, %v1783_v33  ;;  %v2731_v62 = vpop.f32.mrb[56].mxu0 }
 0x2c4   :  { %v1798_v44 = vadd.f32 %v2731_v62, %v3544_v55  ;;  %v1792_v11 = vpop.f32.mrb[57].mxu0 }
 0x2c5   :  { %v1793_v56 = vadd.f32 %v3544_v55, %v1792_v11 }
 0x2c6   :  { %2017 = vst.msk [vmem:[%s3873_s7 + $0xc8] sm:$0xff] %vm1991_vm3, %v1798_v44 }
 0x2c7   :  { %2016 = vst.msk [vmem:[%s3873_s7 + $0xc0] sm:$0xff] %vm1991_vm3, %v1793_v56  ;;  %v2734_v24 = vpop.f32.mrb[58].mxu0 }
 0x2c8   :  { %v1808_v4 = vadd.f32 %v2734_v24, %v3544_v55  ;;  %v1802_v39 = vpop.f32.mrb[59].mxu0 }
 0x2c9   :  { %v1803_v17 = vadd.f32 %v3544_v55, %v1802_v39 }
 0x2ca   :  { %2019 = vst.msk [vmem:[%s3873_s7 + $0xd8] sm:$0xff] %vm1991_vm3, %v1808_v4 }
 0x2cb   :  { %2018 = vst.msk [vmem:[%s3873_s7 + $0xd0] sm:$0xff] %vm1991_vm3, %v1803_v17  ;;  %v2737_v45 = vpop.f32.mrb[60].mxu0 }
 0x2cc   :  { %v1818_v32 = vadd.f32 %v2737_v45, %v3544_v55  ;;  %v1812_v47 = vpop.f32.mrb[61].mxu0 }
 0x2cd   :  { %v1813_v46 = vadd.f32 %v3544_v55, %v1812_v47 }
 0x2ce   :  { %2021 = vst.msk [vmem:[%s3873_s7 + $0xe8] sm:$0xff] %vm1991_vm3, %v1818_v32 }
 0x2cf   :  { %2020 = vst.msk [vmem:[%s3873_s7 + $0xe0] sm:$0xff] %vm1991_vm3, %v1813_v46  ;;  %v2740_v51 = vpop.f32.mrb[62].mxu0 }
 0x2d0   :  { %v1828_v52 = vadd.f32 %v2740_v51, %v3544_v55  ;;  %v1822_v53 = vpop.f32.mrb[63].mxu0 }
 0x2d1   :  { %v1823_v57 = vadd.f32 %v3544_v55, %v1822_v53 }
 0x2d2   :  { %2023 = vst.msk [vmem:[%s3873_s7 + $0xf8] sm:$0xff] %vm1991_vm3, %v1828_v52 }
 0x2d3   :  { %2022 = vst.msk [vmem:[%s3873_s7 + $0xf0] sm:$0xff] %vm1991_vm3, %v1823_v57  ;;  %v2743_v58 = vpop.f32.mrb[64].mxu0 }
 0x2d4   :  { %v1838_v49 = vadd.f32 %v2743_v58, %v3544_v55  ;;  %v1832_v60 = vpop.f32.mrb[65].mxu0 }
 0x2d5   :  { %v1833_v61 = vadd.f32 %v3544_v55, %v1832_v60 }
 0x2d6   :  { %2025 = vst.msk [vmem:[%s3873_s7 + $0x108] sm:$0xff] %vm1991_vm3, %v1838_v49 }
 0x2d7   :  { %2024 = vst.msk [vmem:[%s3873_s7 + $0x100] sm:$0xff] %vm1991_vm3, %v1833_v61  ;;  %v2746_v63 = vpop.f32.mrb[66].mxu0 }
 0x2d8   :  { %v1848_v1 = vadd.f32 %v2746_v63, %v3544_v55  ;;  %v1842_v2 = vpop.f32.mrb[67].mxu0 }
 0x2d9   :  { %v1843_v3 = vadd.f32 %v3544_v55, %v1842_v2 }
 0x2da   :  { %2027 = vst.msk [vmem:[%s3873_s7 + $0x118] sm:$0xff] %vm1991_vm3, %v1848_v1 }
 0x2db   :  { %2026 = vst.msk [vmem:[%s3873_s7 + $0x110] sm:$0xff] %vm1991_vm3, %v1843_v3  ;;  %v2749_v6 = vpop.f32.mrb[68].mxu0 }
 0x2dc   :  { %v1858_v7 = vadd.f32 %v2749_v6, %v3544_v55  ;;  %v1852_v8 = vpop.f32.mrb[69].mxu0 }
 0x2dd   :  { %v1853_v9 = vadd.f32 %v3544_v55, %v1852_v8 }
 0x2de   :  { %2029 = vst.msk [vmem:[%s3873_s7 + $0x128] sm:$0xff] %vm1991_vm3, %v1858_v7 }
 0x2df   :  { %2028 = vst.msk [vmem:[%s3873_s7 + $0x120] sm:$0xff] %vm1991_vm3, %v1853_v9  ;;  %v2752_v12 = vpop.f32.mrb[70].mxu0 }
 0x2e0   :  { %v1868_v13 = vadd.f32 %v2752_v12, %v3544_v55  ;;  %v1862_v14 = vpop.f32.mrb[71].mxu0 }
 0x2e1   :  { %v1863_v16 = vadd.f32 %v3544_v55, %v1862_v14 }
 0x2e2   :  { %2031 = vst.msk [vmem:[%s3873_s7 + $0x138] sm:$0xff] %vm1991_vm3, %v1868_v13 }
 0x2e3   :  { %2030 = vst.msk [vmem:[%s3873_s7 + $0x130] sm:$0xff] %vm1991_vm3, %v1863_v16  ;;  %v2755_v19 = vpop.f32.mrb[72].mxu0 }
 0x2e4   :  { %v1878_v20 = vadd.f32 %v2755_v19, %v3544_v55  ;;  %v1872_v22 = vpop.f32.mrb[73].mxu0 }
 0x2e5   :  { %v1873_v23 = vadd.f32 %v3544_v55, %v1872_v22 }
 0x2e6   :  { %2033 = vst.msk [vmem:[%s3873_s7 + $0x148] sm:$0xff] %vm1991_vm3, %v1878_v20 }
 0x2e7   :  { %2032 = vst.msk [vmem:[%s3873_s7 + $0x140] sm:$0xff] %vm1991_vm3, %v1873_v23  ;;  %v2758_v25 = vpop.f32.mrb[74].mxu0 }
 0x2e8   :  { %v1888_v29 = vadd.f32 %v2758_v25, %v3544_v55  ;;  %v1882_v30 = vpop.f32.mrb[75].mxu0 }
 0x2e9   :  { %v1883_v27 = vadd.f32 %v3544_v55, %v1882_v30 }
 0x2ea   :  { %2035 = vst.msk [vmem:[%s3873_s7 + $0x158] sm:$0xff] %vm1991_vm3, %v1888_v29 }
 0x2eb   :  { %2034 = vst.msk [vmem:[%s3873_s7 + $0x150] sm:$0xff] %vm1991_vm3, %v1883_v27  ;;  %v2761_v31 = vpop.f32.mrb[76].mxu0 }
 0x2ec   :  { %v1898_v34 = vadd.f32 %v2761_v31, %v3544_v55  ;;  %v1892_v35 = vpop.f32.mrb[77].mxu0 }
 0x2ed   :  { %v1893_v36 = vadd.f32 %v3544_v55, %v1892_v35 }
 0x2ee   :  { %2037 = vst.msk [vmem:[%s3873_s7 + $0x168] sm:$0xff] %vm1991_vm3, %v1898_v34 }
 0x2ef   :  { %2036 = vst.msk [vmem:[%s3873_s7 + $0x160] sm:$0xff] %vm1991_vm3, %v1893_v36  ;;  %v2764_v37 = vpop.f32.mrb[78].mxu0 }
 0x2f0   :  { %v1908_v40 = vadd.f32 %v2764_v37, %v3544_v55  ;;  %v1902_v41 = vpop.f32.mrb[79].mxu0 }
 0x2f1   :  { %v1903_v42 = vadd.f32 %v3544_v55, %v1902_v41 }
 0x2f2   :  { %2039 = vst.msk [vmem:[%s3873_s7 + $0x178] sm:$0xff] %vm1991_vm3, %v1908_v40 }
 0x2f3   :  { %2038 = vst.msk [vmem:[%s3873_s7 + $0x170] sm:$0xff] %vm1991_vm3, %v1903_v42  ;;  %v2767_v18 = vpop.f32.mrb[80].mxu0 }
 0x2f4   :  { %v1918_v48 = vadd.f32 %v2767_v18, %v3544_v55  ;;  %v1912_v26 = vpop.f32.mrb[81].mxu0 }
 0x2f5   :  { %v1913_v59 = vadd.f32 %v3544_v55, %v1912_v26 }
 0x2f6   :  { %2041 = vst.msk [vmem:[%s3873_s7 + $0x188] sm:$0xff] %vm1991_vm3, %v1918_v48 }
 0x2f7   :  { %2040 = vst.msk [vmem:[%s3873_s7 + $0x180] sm:$0xff] %vm1991_vm3, %v1913_v59  ;;  %v2770_v43 = vpop.f32.mrb[82].mxu0 }
 0x2f8   :  { %v1928_v5 = vadd.f32 %v2770_v43, %v3544_v55  ;;  %v1922_v54 = vpop.f32.mrb[83].mxu0 }
 0x2f9   :  { %v1923_v15 = vadd.f32 %v3544_v55, %v1922_v54 }
 0x2fa   :  { %2043 = vst.msk [vmem:[%s3873_s7 + $0x198] sm:$0xff] %vm1991_vm3, %v1928_v5 }
 0x2fb   :  { %2042 = vst.msk [vmem:[%s3873_s7 + $0x190] sm:$0xff] %vm1991_vm3, %v1923_v15  ;;  %v2773_v0 = vpop.f32.mrb[84].mxu0 }
 0x2fc   :  { %v1938_v28 = vadd.f32 %v2773_v0, %v3544_v55  ;;  %v1932_v10 = vpop.f32.mrb[85].mxu0 }
 0x2fd   :  { %v1933_v38 = vadd.f32 %v3544_v55, %v1932_v10 }
 0x2fe   :  { %2045 = vst.msk [vmem:[%s3873_s7 + $0x1a8] sm:$0xff] %vm1991_vm3, %v1938_v28 }
 0x2ff   :  { %2044 = vst.msk [vmem:[%s3873_s7 + $0x1a0] sm:$0xff] %vm1991_vm3, %v1933_v38  ;;  %v2776_v21 = vpop.f32.mrb[86].mxu0 }
 0x300   :  { %v1948_v50 = vadd.f32 %v2776_v21, %v3544_v55  ;;  %v1942_v33 = vpop.f32.mrb[87].mxu0 }
 0x301   :  { %v1943_v62 = vadd.f32 %v3544_v55, %v1942_v33 }
 0x302   :  { %2047 = vst.msk [vmem:[%s3873_s7 + $0x1b8] sm:$0xff] %vm1991_vm3, %v1948_v50 }
 0x303   :  { %2046 = vst.msk [vmem:[%s3873_s7 + $0x1b0] sm:$0xff] %vm1991_vm3, %v1943_v62  ;;  %v2779_v44 = vpop.f32.mrb[88].mxu0 }
 0x304   :  { %v1958_v11 = vadd.f32 %v2779_v44, %v3544_v55  ;;  %v1952_v56 = vpop.f32.mrb[89].mxu0 }
 0x305   :  { %v1953_v24 = vadd.f32 %v3544_v55, %v1952_v56 }
 0x306   :  { %2049 = vst.msk [vmem:[%s3873_s7 + $0x1c8] sm:$0xff] %vm1991_vm3, %v1958_v11 }
 0x307   :  { %2048 = vst.msk [vmem:[%s3873_s7 + $0x1c0] sm:$0xff] %vm1991_vm3, %v1953_v24  ;;  %v2782_v4 = vpop.f32.mrb[90].mxu0 }
 0x308   :  { %v1968_v39 = vadd.f32 %v2782_v4, %v3544_v55  ;;  %v1962_v17 = vpop.f32.mrb[91].mxu0 }
 0x309   :  { %v1963_v45 = vadd.f32 %v3544_v55, %v1962_v17 }
 0x30a   :  { %2051 = vst.msk [vmem:[%s3873_s7 + $0x1d8] sm:$0xff] %vm1991_vm3, %v1968_v39 }
 0x30b   :  { %2050 = vst.msk [vmem:[%s3873_s7 + $0x1d0] sm:$0xff] %vm1991_vm3, %v1963_v45  ;;  %v2785_v32 = vpop.f32.mrb[92].mxu0 }
 0x30c   :  { %v1978_v47 = vadd.f32 %v2785_v32, %v3544_v55  ;;  %v1972_v46 = vpop.f32.mrb[93].mxu0 }
 0x30d   :  { %v1973_v51 = vadd.f32 %v3544_v55, %v1972_v46 }
 0x30e   :  { %2053 = vst.msk [vmem:[%s3873_s7 + $0x1e8] sm:$0xff] %vm1991_vm3, %v1978_v47 }
 0x30f   :  { %2052 = vst.msk [vmem:[%s3873_s7 + $0x1e0] sm:$0xff] %vm1991_vm3, %v1973_v51  ;;  %v2788_v52 = vpop.f32.mrb[94].mxu0 }
 0x310   :  { %v1988_v53 = vadd.f32 %v2788_v52, %v3544_v55  ;;  %v1982_v57 = vpop.f32.mrb[95].mxu0 }
 0x311   :  { %v1983_v58 = vadd.f32 %v3544_v55, %v1982_v57 }
 0x312   :  { %2055 = vst.msk [vmem:[%s3873_s7 + $0x1f8] sm:$0xff] %vm1991_vm3, %v1988_v53 }
 0x313   :  { %2054 = vst.msk [vmem:[%s3873_s7 + $0x1f0] sm:$0xff] %vm1991_vm3, %v1983_v58 }

</bundles_post_ra>
